<compile_context>
chip_gen: v5e
topology: v5e:2x2
jax: 0.10.0
libtpu: 0.0.40
codegen_flags: <defaults>
</compile_context>

<pallas_src>
import functools
import math

import jax
import jax.numpy as jnp
import numpy as np
from jax.experimental import pallas as pl
from jax.experimental.pallas import tpu as pltpu


# --------------------------------- kernel ----------------------------------

def decoder_block_kernel(
    x_ref, enc_ref, tgt_mask_ref, src_mask_ref,
    wqkv_s_ref, bqkv_s_ref, wo_s_ref, bo_s_ref,      # self-attention
    wqkv_c_ref, bqkv_c_ref, wo_c_ref, bo_c_ref,      # cross-attention
    w1_ref, b1_ref, w2_ref, b2_ref,                  # feed-forward
    ln_g_ref, ln_b_ref,                              # (3,) scalars, SMEM
    o_ref,
    *, h, compute_dtype):
    cdt = compute_dtype
    f32 = jnp.float32
    Bb, Sq, D = x_ref.shape
    Sk = enc_ref.shape[1]
    d_k = D // h
    scale = 1.0 / math.sqrt(d_k)
    approx = cdt != jnp.float32          # approx EUP recip only off the f32 path

    # Flatten (Bb, S, D) -> (Bb*S, D): LN / projections / FFN run on dense row
    # slabs. Copy-free when Sq/Sk are multiples of the sublane count (8, f32).
    x = x_ref[...].reshape(Bb * Sq, D)
    enc = enc_ref[...].reshape(Bb * Sk, D)

    # Masks arrive as int8; the i8->i32 widen is a cheap unpack (no f32 cast).
    tgt_vis = tgt_mask_ref[...].astype(jnp.int32) != 0        # (Sq, Sq) bool
    src_vis = src_mask_ref[...].astype(jnp.int32) != 0        # (Sq, Sk) bool

    def layer_norm(y, gamma, beta, eps=1e-6):
        # Matches LayerNormalization: scalar gamma/beta, unbiased std (N-1),
        # eps added to the std (not the variance).
        n = y.shape[-1]
        mean = jnp.mean(y, axis=-1, keepdims=True)
        diff = y - mean
        std = jnp.sqrt(jnp.sum(diff * diff, axis=-1, keepdims=True) / (n - 1))
        inv = pl.reciprocal(std + eps, approx=approx)          # EUP slot
        return gamma * diff * inv + beta

    def softmax(s):
        s = s - jnp.max(s, axis=-1, keepdims=True)
        p = jnp.exp(s)
        denom = jnp.sum(p, axis=-1, keepdims=True)
        if approx:
            return p * pl.reciprocal(denom, approx=True)       # EUP slot
        return p / denom

    def attention(q, k, v, vis, wo_ref, bo_ref):
        # q: (Bb, sq, D); k, v: (Bb, sk, D) -- f32 activations.
        # wo_ref: (D, D) compute dtype; bo_ref: (1, D) f32.
        sq = q.shape[1]
        qc, kc, vc = q.astype(cdt), k.astype(cdt), v.astype(cdt)
        vis_b = vis[None, :, :]
        ctx_heads = []
        # Static head loop with static lane slices (h is small); scores are
        # computed one head at a time with batched dot_generals over Bb, so
        # only one (Bb, sq, sk) tile is live per iteration.
        for i in range(h):
            sl = slice(i * d_k, (i + 1) * d_k)
            s = jnp.einsum('bqd,bkd->bqk', qc[:, :, sl], kc[:, :, sl],
                           preferred_element_type=f32) * scale
            s = jnp.where(vis_b, s, jnp.float32(-1e9))
            p = softmax(s).astype(cdt)
            ctx_heads.append(jnp.einsum('bqk,bkd->bqd', p, vc[:, :, sl],
                                        preferred_element_type=f32))
        # Concat heads along lanes -> one full-depth (rows, D) @ (D, D) W_o.
        ctx = jnp.concatenate(ctx_heads, axis=-1).reshape(Bb * sq, D)
        out = jnp.dot(ctx.astype(cdt), wo_ref[...], preferred_element_type=f32)
        return out + bo_ref[...]

    # ---- residual 1: self-attention on pre-normed x ------------------------
    xn = layer_norm(x, ln_g_ref[0], ln_b_ref[0])
    qkv = jnp.dot(xn.astype(cdt), wqkv_s_ref[...],
                  preferred_element_type=f32) + bqkv_s_ref[...]   # (Bb*Sq, 3D)
    x1 = x + attention(qkv[:, :D].reshape(Bb, Sq, D),
                       qkv[:, D:2 * D].reshape(Bb, Sq, D),
                       qkv[:, 2 * D:].reshape(Bb, Sq, D),
                       tgt_vis, wo_s_ref, bo_s_ref)

    # ---- residual 2: cross-attention (K/V from the raw encoder output) -----
    x1n = layer_norm(x1, ln_g_ref[1], ln_b_ref[1])
    wqkv_c = wqkv_c_ref[...]
    bqkv_c = bqkv_c_ref[...]
    q_c = jnp.dot(x1n.astype(cdt), wqkv_c[:, :D],
                  preferred_element_type=f32) + bqkv_c[:, :D]     # (Bb*Sq, D)
    kv_c = jnp.dot(enc.astype(cdt), wqkv_c[:, D:],
                   preferred_element_type=f32) + bqkv_c[:, D:]    # (Bb*Sk, 2D)
    x2 = x1 + attention(q_c.reshape(Bb, Sq, D),
                        kv_c[:, :D].reshape(Bb, Sk, D),
                        kv_c[:, D:].reshape(Bb, Sk, D),
                        src_vis, wo_c_ref, bo_c_ref)

    # ---- residual 3: feed-forward -------------------------------------------
    x2n = layer_norm(x2, ln_g_ref[2], ln_b_ref[2])
    hid = jnp.dot(x2n.astype(cdt), w1_ref[...],
                  preferred_element_type=f32) + b1_ref[...]
    hid = jnp.maximum(hid, 0.0).astype(cdt)      # cast the large intermediate early
    ff = jnp.dot(hid, w2_ref[...], preferred_element_type=f32) + b2_ref[...]
    o_ref[...] = (x2 + ff).reshape(Bb, Sq, D).astype(o_ref.dtype)


# ---------------------------- wrapper & packing ------------------------------

def _vmem_limit_bytes():
    # Leave ~25% headroom below physical VMEM (v7x only has 64 MiB per TC;
    # v5e/v6e have 128 MiB). Falls back to a conservative 48 MiB.
    default_cap = 64 * 1024 * 1024
    try:
        cap = getattr(pltpu.get_tpu_info(), "vmem_capacity_bytes", default_cap)
    except Exception:
        cap = default_cap
    return min(int(cap) * 3 // 4, 100 * 1024 * 1024)


def pack_decoder_weights(params, *, compute_dtype=jnp.bfloat16):
    """One-time packing: 20 raw Linear params -> 12 kernel tensors.

    Called once (outside the per-call wrapper) so repeated forward calls do
    not pay the QKV concat + dtype casts again.
    """
    wdt = compute_dtype
    D = params["w_sq"].shape[0]
    d_ff = params["w1"].shape[1]

    def qkv_cat(pfx):
        w = jnp.concatenate([params[f"w_{pfx}q"], params[f"w_{pfx}k"],
                             params[f"w_{pfx}v"]], axis=1).astype(wdt)
        b = jnp.concatenate([params[f"b_{pfx}q"], params[f"b_{pfx}k"],
                             params[f"b_{pfx}v"]]).reshape(1, 3 * D)
        return w, b

    wqkv_s, bqkv_s = qkv_cat("s")
    wqkv_c, bqkv_c = qkv_cat("c")
    weights = [
        wqkv_s, bqkv_s,
        params["w_so"].astype(wdt), params["b_so"].reshape(1, D),
        wqkv_c, bqkv_c,
        params["w_co"].astype(wdt), params["b_co"].reshape(1, D),
        params["w1"].astype(wdt), params["b1"].reshape(1, d_ff),
        params["w2"].astype(wdt), params["b2"].reshape(1, D),
    ]
    return {"weights": weights, "ln_g": params["ln_g"], "ln_b": params["ln_b"],
            "compute_dtype": compute_dtype}


def decoder_block(x, enc, tgt_mask, src_mask, packed, *, h, block_b=None):
    B, Sq, D = x.shape
    _, Sk, _ = enc.shape
    assert D % h == 0
    compute_dtype = packed["compute_dtype"]
    weights = packed["weights"]

    # Batch fold: several batch rows per grid step (denser sublanes, amortised
    # per-step overhead), but keep >= 2 grid steps so v7x's second TensorCore
    # gets work from the "parallel" axis.
    if block_b is None:
        block_b = min(B, 8)
    block_b = max(1, min(block_b, B))
    if B >= 2:
        block_b = max(1, min(block_b, B // 2))
    while B % block_b:
        block_b -= 1

    # Masks assumed batch-independent (shared (Sq,Sq)/(Sq,Sk)), shipped as int8
    # (4x less DMA than f32).
    tgt_m = (jnp.broadcast_to(tgt_mask, (Sq, Sq)) != 0).astype(jnp.int8)
    src_m = (jnp.broadcast_to(src_mask, (Sq, Sk)) != 0).astype(jnp.int8)

    def resident(arr):
        # Grid-constant operand: single-buffered (no double-buffer copy).
        nd = arr.ndim
        return pl.BlockSpec(arr.shape, lambda *_: (0,) * nd,
                            pipeline_mode=pl.Buffered(1))

    in_specs = [
        pl.BlockSpec((block_b, Sq, D), lambda b: (b, 0, 0)),   # x
        pl.BlockSpec((block_b, Sk, D), lambda b: (b, 0, 0)),   # encoder output
        resident(tgt_m),                                       # tgt_mask i8
        resident(src_m),                                       # src_mask i8
    ] + [resident(w) for w in weights] + [
        pl.BlockSpec(memory_space=pltpu.MemorySpace.SMEM),     # ln gamma (3,)
        pl.BlockSpec(memory_space=pltpu.MemorySpace.SMEM),     # ln beta  (3,)
    ]

    kernel = functools.partial(decoder_block_kernel, h=h,
                               compute_dtype=compute_dtype)
    return pl.pallas_call(
        kernel,
        out_shape=jax.ShapeDtypeStruct((B, Sq, D), x.dtype),
        grid=(B // block_b,),
        in_specs=in_specs,
        out_specs=pl.BlockSpec((block_b, Sq, D), lambda b: (b, 0, 0)),
        compiler_params=pltpu.CompilerParams(
            dimension_semantics=("parallel",),       # shard batch over 2 TCs (v7x)
            vmem_limit_bytes=_vmem_limit_bytes()),
    )(x, enc, tgt_m, src_m, *weights, packed["ln_g"], packed["ln_b"])


# --------------------------- params & reference ------------------------------

def init_params(key, D, d_ff):
    keys = jax.random.split(key, 10)

    def lin(k, din, dout):
        kw, kb = jax.random.split(k)
        w = jax.random.normal(kw, (din, dout), jnp.float32) / jnp.sqrt(din)
        b = jax.random.normal(kb, (dout,), jnp.float32) * 0.01
        return w, b

    p = {}
    names = ["sq", "sk", "sv", "so", "cq", "ck", "cv", "co"]
    for i, name in enumerate(names):
        p[f"w_{name}"], p[f"b_{name}"] = lin(keys[i], D, D)
    p["w1"], p["b1"] = lin(keys[8], D, d_ff)
    p["w2"], p["b2"] = lin(keys[9], d_ff, D)
    # LayerNormalization.__init__: gamma = ones(1), beta = zeros(1), one per
    # residual connection (3 total).
    p["ln_g"] = jnp.ones((3,), jnp.float32)
    p["ln_b"] = jnp.zeros((3,), jnp.float32)
    return p


def decoder_block_ref(x, enc, tgt_mask, src_mask, p, *, h):
    """Pure-JAX reference mirroring the PyTorch module (dropout = identity)."""
    D = x.shape[-1]
    d_k = D // h

    def ln(y, g, b, eps=1e-6):
        mean = y.mean(-1, keepdims=True)
        std = jnp.sqrt(((y - mean) ** 2).sum(-1, keepdims=True)
                       / (y.shape[-1] - 1))
        return g * (y - mean) / (std + eps) + b

    def mha(q_in, kv_in, mask, wq, bq, wk, bk, wv, bv, wo, bo):
        B, Sq, _ = q_in.shape
        Sk = kv_in.shape[1]
        q = (q_in @ wq + bq).reshape(B, Sq, h, d_k).transpose(0, 2, 1, 3)
        k = (kv_in @ wk + bk).reshape(B, Sk, h, d_k).transpose(0, 2, 1, 3)
        v = (kv_in @ wv + bv).reshape(B, Sk, h, d_k).transpose(0, 2, 1, 3)
        s = q @ k.transpose(0, 1, 3, 2) / math.sqrt(d_k)
        s = jnp.where(mask == 0, -1e9, s)
        a = jax.nn.softmax(s, axis=-1)
        ctx = (a @ v).transpose(0, 2, 1, 3).reshape(B, Sq, D)
        return ctx @ wo + bo

    g, bt = p["ln_g"], p["ln_b"]
    xn = ln(x, g[0], bt[0])
    x1 = x + mha(xn, xn, tgt_mask,
                 p["w_sq"], p["b_sq"], p["w_sk"], p["b_sk"],
                 p["w_sv"], p["b_sv"], p["w_so"], p["b_so"])
    x1n = ln(x1, g[1], bt[1])
    x2 = x1 + mha(x1n, enc, src_mask,
                  p["w_cq"], p["b_cq"], p["w_ck"], p["b_ck"],
                  p["w_cv"], p["b_cv"], p["w_co"], p["b_co"])
    x2n = ln(x2, g[2], bt[2])
    ff = jnp.maximum(x2n @ p["w1"] + p["b1"], 0.0) @ p["w2"] + p["b2"]
    return x2 + ff


# ----------------------------------- main ------------------------------------

if __name__ == "__main__":
    B, Sq, Sk, D, h, d_ff = 2, 8, 16, 32, 4, 64

    key = jax.random.PRNGKey(0)
    kx, ke, kp = jax.random.split(key, 3)
    x = jax.random.normal(kx, (B, Sq, D), jnp.float32)
    enc = jax.random.normal(ke, (B, Sk, D), jnp.float32)

    tgt_mask = jnp.tril(jnp.ones((Sq, Sq), jnp.float32))          # causal
    src_mask = jnp.broadcast_to(
        (jnp.arange(Sk) < Sk - 2).astype(jnp.float32), (Sq, Sk))  # pad last 2

    params = init_params(kp, D, d_ff)
    ref = decoder_block_ref(x, enc, tgt_mask, src_mask, params, h=h)

    # Exact-precision path: must match the PyTorch-equivalent reference tightly.
    packed_f32 = pack_decoder_weights(params, compute_dtype=jnp.float32)
    out_f32 = decoder_block(x, enc, tgt_mask, src_mask, packed_f32, h=h)
    out_f32 = jax.block_until_ready(out_f32)
    np.testing.assert_allclose(np.asarray(out_f32), np.asarray(ref),
                               rtol=5e-3, atol=5e-3)

    # bf16 MXU path (v5e/v6e/v7x production setting): looser tolerance for the
    # reduced-precision matmuls (f32 accumulation, f32 scores/softmax).
    packed_bf16 = pack_decoder_weights(params, compute_dtype=jnp.bfloat16)
    out_bf16 = decoder_block(x, enc, tgt_mask, src_mask, packed_bf16, h=h)
    out_bf16 = jax.block_until_ready(out_bf16)
    np.testing.assert_allclose(np.asarray(out_bf16), np.asarray(ref),
                               rtol=5e-2, atol=1e-1)

    print("KERNEL_OK")
</pallas_src>

<mosaic_0001>
module attributes {stable_mosaic.version = 11 : i64} {
  func.func @decoder_block_kernel(%arg0: i32, %arg1: memref<1x8x32xf32, #tpu.memory_space<vmem>>, %arg2: memref<1x16x32xf32, #tpu.memory_space<vmem>>, %arg3: memref<8x8xi8, #tpu.memory_space<vmem>>, %arg4: memref<8x16xi8, #tpu.memory_space<vmem>>, %arg5: memref<32x96xf32, #tpu.memory_space<vmem>>, %arg6: memref<1x96xf32, #tpu.memory_space<vmem>>, %arg7: memref<32x32xf32, #tpu.memory_space<vmem>>, %arg8: memref<1x32xf32, #tpu.memory_space<vmem>>, %arg9: memref<32x96xf32, #tpu.memory_space<vmem>>, %arg10: memref<1x96xf32, #tpu.memory_space<vmem>>, %arg11: memref<32x32xf32, #tpu.memory_space<vmem>>, %arg12: memref<1x32xf32, #tpu.memory_space<vmem>>, %arg13: memref<32x64xf32, #tpu.memory_space<vmem>>, %arg14: memref<1x64xf32, #tpu.memory_space<vmem>>, %arg15: memref<64x32xf32, #tpu.memory_space<vmem>>, %arg16: memref<1x32xf32, #tpu.memory_space<vmem>>, %arg17: memref<3xf32, #tpu.memory_space<smem>>, %arg18: memref<3xf32, #tpu.memory_space<smem>>, %arg19: memref<1x8x32xf32, #tpu.memory_space<vmem>>) attributes {dimension_semantics = [#tpu.dimension_semantics<parallel>], iteration_bounds = array<i64: 2>, scalar_prefetch = 0 : i64, scratch_operands = 0 : i64, tpu.core_type = #tpu.core_type<tc>, window_params = [{transform_indices = @transform_0, window_bounds = array<i64: 1, 8, 32>}, {transform_indices = @transform_1, window_bounds = array<i64: 1, 16, 32>}, {pipeline_mode = #tpu.pipeline_mode<synchronous>, transform_indices = @transform_2, window_bounds = array<i64: 8, 8>}, {pipeline_mode = #tpu.pipeline_mode<synchronous>, transform_indices = @transform_3, window_bounds = array<i64: 8, 16>}, {pipeline_mode = #tpu.pipeline_mode<synchronous>, transform_indices = @transform_4, window_bounds = array<i64: 32, 96>}, {pipeline_mode = #tpu.pipeline_mode<synchronous>, transform_indices = @transform_5, window_bounds = array<i64: 1, 96>}, {pipeline_mode = #tpu.pipeline_mode<synchronous>, transform_indices = @transform_6, window_bounds = array<i64: 32, 32>}, {pipeline_mode = #tpu.pipeline_mode<synchronous>, transform_indices = @transform_7, window_bounds = array<i64: 1, 32>}, {pipeline_mode = #tpu.pipeline_mode<synchronous>, transform_indices = @transform_8, window_bounds = array<i64: 32, 96>}, {pipeline_mode = #tpu.pipeline_mode<synchronous>, transform_indices = @transform_9, window_bounds = array<i64: 1, 96>}, {pipeline_mode = #tpu.pipeline_mode<synchronous>, transform_indices = @transform_10, window_bounds = array<i64: 32, 32>}, {pipeline_mode = #tpu.pipeline_mode<synchronous>, transform_indices = @transform_11, window_bounds = array<i64: 1, 32>}, {pipeline_mode = #tpu.pipeline_mode<synchronous>, transform_indices = @transform_12, window_bounds = array<i64: 32, 64>}, {pipeline_mode = #tpu.pipeline_mode<synchronous>, transform_indices = @transform_13, window_bounds = array<i64: 1, 64>}, {pipeline_mode = #tpu.pipeline_mode<synchronous>, transform_indices = @transform_14, window_bounds = array<i64: 64, 32>}, {pipeline_mode = #tpu.pipeline_mode<synchronous>, transform_indices = @transform_15, window_bounds = array<i64: 1, 32>}, {transform_indices = @transform_16, window_bounds = array<i64: 3>}, {transform_indices = @transform_17, window_bounds = array<i64: 3>}, {transform_indices = @transform_18, window_bounds = array<i64: 1, 8, 32>}]} {
    %c0 = arith.constant 0 : index
    %c0_0 = arith.constant 0 : index
    %c0_1 = arith.constant 0 : index
    %0 = vector.load %arg1[%c0, %c0_0, %c0_1] : memref<1x8x32xf32, #tpu.memory_space<vmem>>, vector<1x8x32xf32>
    %1 = vector.shape_cast %0 : vector<1x8x32xf32> to vector<8x32xf32>
    %c0_2 = arith.constant 0 : index
    %c0_3 = arith.constant 0 : index
    %c0_4 = arith.constant 0 : index
    %2 = vector.load %arg2[%c0_2, %c0_3, %c0_4] : memref<1x16x32xf32, #tpu.memory_space<vmem>>, vector<1x16x32xf32>
    %3 = vector.shape_cast %2 : vector<1x16x32xf32> to vector<16x32xf32>
    %c0_5 = arith.constant 0 : index
    %c0_6 = arith.constant 0 : index
    %4 = vector.load %arg3[%c0_5, %c0_6] : memref<8x8xi8, #tpu.memory_space<vmem>>, vector<8x8xi8>
    %5 = arith.extsi %4 : vector<8x8xi8> to vector<8x8xi32>
    %c0_i32 = arith.constant 0 : i32
    %6 = vector.broadcast %c0_i32 : i32 to vector<8x8xi32>
    %7 = arith.cmpi ne, %5, %6 : vector<8x8xi32>
    %c0_7 = arith.constant 0 : index
    %c0_8 = arith.constant 0 : index
    %8 = vector.load %arg4[%c0_7, %c0_8] : memref<8x16xi8, #tpu.memory_space<vmem>>, vector<8x16xi8>
    %9 = arith.extsi %8 : vector<8x16xi8> to vector<8x16xi32>
    %c0_i32_9 = arith.constant 0 : i32
    %10 = vector.broadcast %c0_i32_9 : i32 to vector<8x16xi32>
    %11 = arith.cmpi ne, %9, %10 : vector<8x16xi32>
    %c0_10 = arith.constant 0 : index
    %12 = memref.load %arg17[%c0_10] : memref<3xf32, #tpu.memory_space<smem>>
    %c0_11 = arith.constant 0 : index
    %13 = memref.load %arg18[%c0_11] : memref<3xf32, #tpu.memory_space<smem>>
    %cst = arith.constant dense<0.000000e+00> : vector<8xf32>
    %14 = vector.multi_reduction <add>, %1, %cst [1] : vector<8x32xf32> to vector<8xf32>
    %15 = vector.shape_cast %14 : vector<8xf32> to vector<8x1xf32>
    %cst_12 = arith.constant 3.200000e+01 : f32
    %16 = vector.broadcast %cst_12 : f32 to vector<8x1xf32>
    %17 = arith.divf %15, %16 : vector<8x1xf32>
    %18 = vector.broadcast %17 : vector<8x1xf32> to vector<8x32xf32>
    %19 = arith.subf %1, %18 : vector<8x32xf32>
    %20 = arith.mulf %19, %19 : vector<8x32xf32>
    %cst_13 = arith.constant dense<0.000000e+00> : vector<8xf32>
    %21 = vector.multi_reduction <add>, %20, %cst_13 [1] : vector<8x32xf32> to vector<8xf32>
    %22 = vector.shape_cast %21 : vector<8xf32> to vector<8x1xf32>
    %cst_14 = arith.constant 3.100000e+01 : f32
    %23 = vector.broadcast %cst_14 : f32 to vector<8x1xf32>
    %24 = arith.divf %22, %23 : vector<8x1xf32>
    %25 = math.sqrt %24 : vector<8x1xf32>
    %cst_15 = arith.constant 9.99999997E-7 : f32
    %26 = vector.broadcast %cst_15 : f32 to vector<8x1xf32>
    %27 = arith.addf %25, %26 : vector<8x1xf32>
    %28 = tpu.reciprocal %27 : vector<8x1xf32> -> vector<8x1xf32>
    %29 = vector.broadcast %12 : f32 to vector<8x32xf32>
    %30 = arith.mulf %29, %19 : vector<8x32xf32>
    %31 = vector.broadcast %28 : vector<8x1xf32> to vector<8x32xf32>
    %32 = arith.mulf %30, %31 : vector<8x32xf32>
    %33 = vector.broadcast %13 : f32 to vector<8x32xf32>
    %34 = arith.addf %32, %33 : vector<8x32xf32>
    %c0_16 = arith.constant 0 : index
    %c0_17 = arith.constant 0 : index
    %35 = vector.load %arg5[%c0_16, %c0_17] : memref<32x96xf32, #tpu.memory_space<vmem>>, vector<32x96xf32>
    %cst_18 = arith.constant dense<0.000000e+00> : vector<8x96xf32>
    %36 = tpu.matmul %34, %35, %cst_18 {dimension_numbers = #tpu.dot_dimension_numbers<[1], [0], [0], [1], [0, 0, 1, 1], [], []>} : vector<8x32xf32>, vector<32x96xf32>, vector<8x96xf32> -> vector<8x96xf32>
    %c0_19 = arith.constant 0 : index
    %c0_20 = arith.constant 0 : index
    %37 = vector.load %arg6[%c0_19, %c0_20] : memref<1x96xf32, #tpu.memory_space<vmem>>, vector<1x96xf32>
    %38 = vector.broadcast %37 : vector<1x96xf32> to vector<8x96xf32>
    %39 = arith.addf %36, %38 : vector<8x96xf32>
    %40 = vector.extract_strided_slice %39 {offsets = [0, 0], sizes = [8, 32], strides = [1, 1]} : vector<8x96xf32> to vector<8x32xf32>
    %41 = vector.shape_cast %40 : vector<8x32xf32> to vector<1x8x32xf32>
    %42 = vector.extract_strided_slice %39 {offsets = [0, 32], sizes = [8, 32], strides = [1, 1]} : vector<8x96xf32> to vector<8x32xf32>
    %43 = vector.shape_cast %42 : vector<8x32xf32> to vector<1x8x32xf32>
    %44 = vector.extract_strided_slice %39 {offsets = [0, 64], sizes = [8, 32], strides = [1, 1]} : vector<8x96xf32> to vector<8x32xf32>
    %45 = vector.shape_cast %44 : vector<8x32xf32> to vector<1x8x32xf32>
    %46 = vector.shape_cast %7 : vector<8x8xi1> to vector<1x8x8xi1>
    %47 = vector.extract_strided_slice %41 {offsets = [0, 0, 0], sizes = [1, 8, 8], strides = [1, 1, 1]} : vector<1x8x32xf32> to vector<1x8x8xf32>
    %48 = vector.extract_strided_slice %43 {offsets = [0, 0, 0], sizes = [1, 8, 8], strides = [1, 1, 1]} : vector<1x8x32xf32> to vector<1x8x8xf32>
    "tpu.trace_start"() <{level = 10 : i32, message = "bqd,bkd->bqk"}> : () -> ()
    %cst_21 = arith.constant dense<0.000000e+00> : vector<1x8x8xf32>
    %49 = tpu.matmul %47, %48, %cst_21 {dimension_numbers = #tpu.dot_dimension_numbers<[2], [2], [1], [1], [0, 0, 0, 1, 1, 1], [0], [0]>} : vector<1x8x8xf32>, vector<1x8x8xf32>, vector<1x8x8xf32> -> vector<1x8x8xf32>
    "tpu.trace_stop"() : () -> ()
    %cst_22 = arith.constant 0.353553385 : f32
    %50 = vector.broadcast %cst_22 : f32 to vector<1x8x8xf32>
    %51 = arith.mulf %49, %50 : vector<1x8x8xf32>
    %cst_23 = arith.constant -1.000000e+09 : f32
    %52 = vector.broadcast %cst_23 : f32 to vector<1x8x8xf32>
    %53 = arith.select %46, %51, %52 : vector<1x8x8xi1>, vector<1x8x8xf32>
    %cst_24 = arith.constant dense<0xFF800000> : vector<1x8xf32>
    %54 = vector.multi_reduction <maximumf>, %53, %cst_24 [2] : vector<1x8x8xf32> to vector<1x8xf32>
    %55 = vector.shape_cast %54 : vector<1x8xf32> to vector<1x8x1xf32>
    %56 = vector.broadcast %55 : vector<1x8x1xf32> to vector<1x8x8xf32>
    %57 = arith.subf %53, %56 : vector<1x8x8xf32>
    %58 = math.exp %57 : vector<1x8x8xf32>
    %cst_25 = arith.constant dense<0.000000e+00> : vector<1x8xf32>
    %59 = vector.multi_reduction <add>, %58, %cst_25 [2] : vector<1x8x8xf32> to vector<1x8xf32>
    %60 = vector.shape_cast %59 : vector<1x8xf32> to vector<1x8x1xf32>
    %61 = vector.broadcast %60 : vector<1x8x1xf32> to vector<1x8x8xf32>
    %62 = arith.divf %58, %61 : vector<1x8x8xf32>
    %63 = vector.extract_strided_slice %45 {offsets = [0, 0, 0], sizes = [1, 8, 8], strides = [1, 1, 1]} : vector<1x8x32xf32> to vector<1x8x8xf32>
    "tpu.trace_start"() <{level = 10 : i32, message = "bqk,bkd->bqd"}> : () -> ()
    %cst_26 = arith.constant dense<0.000000e+00> : vector<1x8x8xf32>
    %64 = tpu.matmul %62, %63, %cst_26 {dimension_numbers = #tpu.dot_dimension_numbers<[2], [1], [1], [2], [0, 0, 0, 1, 1, 2], [0], [0]>} : vector<1x8x8xf32>, vector<1x8x8xf32>, vector<1x8x8xf32> -> vector<1x8x8xf32>
    "tpu.trace_stop"() : () -> ()
    %65 = vector.extract_strided_slice %41 {offsets = [0, 0, 8], sizes = [1, 8, 8], strides = [1, 1, 1]} : vector<1x8x32xf32> to vector<1x8x8xf32>
    %66 = vector.extract_strided_slice %43 {offsets = [0, 0, 8], sizes = [1, 8, 8], strides = [1, 1, 1]} : vector<1x8x32xf32> to vector<1x8x8xf32>
    "tpu.trace_start"() <{level = 10 : i32, message = "bqd,bkd->bqk"}> : () -> ()
    %cst_27 = arith.constant dense<0.000000e+00> : vector<1x8x8xf32>
    %67 = tpu.matmul %65, %66, %cst_27 {dimension_numbers = #tpu.dot_dimension_numbers<[2], [2], [1], [1], [0, 0, 0, 1, 1, 1], [0], [0]>} : vector<1x8x8xf32>, vector<1x8x8xf32>, vector<1x8x8xf32> -> vector<1x8x8xf32>
    "tpu.trace_stop"() : () -> ()
    %cst_28 = arith.constant 0.353553385 : f32
    %68 = vector.broadcast %cst_28 : f32 to vector<1x8x8xf32>
    %69 = arith.mulf %67, %68 : vector<1x8x8xf32>
    %cst_29 = arith.constant -1.000000e+09 : f32
    %70 = vector.broadcast %cst_29 : f32 to vector<1x8x8xf32>
    %71 = arith.select %46, %69, %70 : vector<1x8x8xi1>, vector<1x8x8xf32>
    %cst_30 = arith.constant dense<0xFF800000> : vector<1x8xf32>
    %72 = vector.multi_reduction <maximumf>, %71, %cst_30 [2] : vector<1x8x8xf32> to vector<1x8xf32>
    %73 = vector.shape_cast %72 : vector<1x8xf32> to vector<1x8x1xf32>
    %74 = vector.broadcast %73 : vector<1x8x1xf32> to vector<1x8x8xf32>
    %75 = arith.subf %71, %74 : vector<1x8x8xf32>
    %76 = math.exp %75 : vector<1x8x8xf32>
    %cst_31 = arith.constant dense<0.000000e+00> : vector<1x8xf32>
    %77 = vector.multi_reduction <add>, %76, %cst_31 [2] : vector<1x8x8xf32> to vector<1x8xf32>
    %78 = vector.shape_cast %77 : vector<1x8xf32> to vector<1x8x1xf32>
    %79 = vector.broadcast %78 : vector<1x8x1xf32> to vector<1x8x8xf32>
    %80 = arith.divf %76, %79 : vector<1x8x8xf32>
    %81 = vector.extract_strided_slice %45 {offsets = [0, 0, 8], sizes = [1, 8, 8], strides = [1, 1, 1]} : vector<1x8x32xf32> to vector<1x8x8xf32>
    "tpu.trace_start"() <{level = 10 : i32, message = "bqk,bkd->bqd"}> : () -> ()
    %cst_32 = arith.constant dense<0.000000e+00> : vector<1x8x8xf32>
    %82 = tpu.matmul %80, %81, %cst_32 {dimension_numbers = #tpu.dot_dimension_numbers<[2], [1], [1], [2], [0, 0, 0, 1, 1, 2], [0], [0]>} : vector<1x8x8xf32>, vector<1x8x8xf32>, vector<1x8x8xf32> -> vector<1x8x8xf32>
    "tpu.trace_stop"() : () -> ()
    %83 = vector.extract_strided_slice %41 {offsets = [0, 0, 16], sizes = [1, 8, 8], strides = [1, 1, 1]} : vector<1x8x32xf32> to vector<1x8x8xf32>
    %84 = vector.extract_strided_slice %43 {offsets = [0, 0, 16], sizes = [1, 8, 8], strides = [1, 1, 1]} : vector<1x8x32xf32> to vector<1x8x8xf32>
    "tpu.trace_start"() <{level = 10 : i32, message = "bqd,bkd->bqk"}> : () -> ()
    %cst_33 = arith.constant dense<0.000000e+00> : vector<1x8x8xf32>
    %85 = tpu.matmul %83, %84, %cst_33 {dimension_numbers = #tpu.dot_dimension_numbers<[2], [2], [1], [1], [0, 0, 0, 1, 1, 1], [0], [0]>} : vector<1x8x8xf32>, vector<1x8x8xf32>, vector<1x8x8xf32> -> vector<1x8x8xf32>
    "tpu.trace_stop"() : () -> ()
    %cst_34 = arith.constant 0.353553385 : f32
    %86 = vector.broadcast %cst_34 : f32 to vector<1x8x8xf32>
    %87 = arith.mulf %85, %86 : vector<1x8x8xf32>
    %cst_35 = arith.constant -1.000000e+09 : f32
    %88 = vector.broadcast %cst_35 : f32 to vector<1x8x8xf32>
    %89 = arith.select %46, %87, %88 : vector<1x8x8xi1>, vector<1x8x8xf32>
    %cst_36 = arith.constant dense<0xFF800000> : vector<1x8xf32>
    %90 = vector.multi_reduction <maximumf>, %89, %cst_36 [2] : vector<1x8x8xf32> to vector<1x8xf32>
    %91 = vector.shape_cast %90 : vector<1x8xf32> to vector<1x8x1xf32>
    %92 = vector.broadcast %91 : vector<1x8x1xf32> to vector<1x8x8xf32>
    %93 = arith.subf %89, %92 : vector<1x8x8xf32>
    %94 = math.exp %93 : vector<1x8x8xf32>
    %cst_37 = arith.constant dense<0.000000e+00> : vector<1x8xf32>
    %95 = vector.multi_reduction <add>, %94, %cst_37 [2] : vector<1x8x8xf32> to vector<1x8xf32>
    %96 = vector.shape_cast %95 : vector<1x8xf32> to vector<1x8x1xf32>
    %97 = vector.broadcast %96 : vector<1x8x1xf32> to vector<1x8x8xf32>
    %98 = arith.divf %94, %97 : vector<1x8x8xf32>
    %99 = vector.extract_strided_slice %45 {offsets = [0, 0, 16], sizes = [1, 8, 8], strides = [1, 1, 1]} : vector<1x8x32xf32> to vector<1x8x8xf32>
    "tpu.trace_start"() <{level = 10 : i32, message = "bqk,bkd->bqd"}> : () -> ()
    %cst_38 = arith.constant dense<0.000000e+00> : vector<1x8x8xf32>
    %100 = tpu.matmul %98, %99, %cst_38 {dimension_numbers = #tpu.dot_dimension_numbers<[2], [1], [1], [2], [0, 0, 0, 1, 1, 2], [0], [0]>} : vector<1x8x8xf32>, vector<1x8x8xf32>, vector<1x8x8xf32> -> vector<1x8x8xf32>
    "tpu.trace_stop"() : () -> ()
    %101 = vector.extract_strided_slice %41 {offsets = [0, 0, 24], sizes = [1, 8, 8], strides = [1, 1, 1]} : vector<1x8x32xf32> to vector<1x8x8xf32>
    %102 = vector.extract_strided_slice %43 {offsets = [0, 0, 24], sizes = [1, 8, 8], strides = [1, 1, 1]} : vector<1x8x32xf32> to vector<1x8x8xf32>
    "tpu.trace_start"() <{level = 10 : i32, message = "bqd,bkd->bqk"}> : () -> ()
    %cst_39 = arith.constant dense<0.000000e+00> : vector<1x8x8xf32>
    %103 = tpu.matmul %101, %102, %cst_39 {dimension_numbers = #tpu.dot_dimension_numbers<[2], [2], [1], [1], [0, 0, 0, 1, 1, 1], [0], [0]>} : vector<1x8x8xf32>, vector<1x8x8xf32>, vector<1x8x8xf32> -> vector<1x8x8xf32>
    "tpu.trace_stop"() : () -> ()
    %cst_40 = arith.constant 0.353553385 : f32
    %104 = vector.broadcast %cst_40 : f32 to vector<1x8x8xf32>
    %105 = arith.mulf %103, %104 : vector<1x8x8xf32>
    %cst_41 = arith.constant -1.000000e+09 : f32
    %106 = vector.broadcast %cst_41 : f32 to vector<1x8x8xf32>
    %107 = arith.select %46, %105, %106 : vector<1x8x8xi1>, vector<1x8x8xf32>
    %cst_42 = arith.constant dense<0xFF800000> : vector<1x8xf32>
    %108 = vector.multi_reduction <maximumf>, %107, %cst_42 [2] : vector<1x8x8xf32> to vector<1x8xf32>
    %109 = vector.shape_cast %108 : vector<1x8xf32> to vector<1x8x1xf32>
    %110 = vector.broadcast %109 : vector<1x8x1xf32> to vector<1x8x8xf32>
    %111 = arith.subf %107, %110 : vector<1x8x8xf32>
    %112 = math.exp %111 : vector<1x8x8xf32>
    %cst_43 = arith.constant dense<0.000000e+00> : vector<1x8xf32>
    %113 = vector.multi_reduction <add>, %112, %cst_43 [2] : vector<1x8x8xf32> to vector<1x8xf32>
    %114 = vector.shape_cast %113 : vector<1x8xf32> to vector<1x8x1xf32>
    %115 = vector.broadcast %114 : vector<1x8x1xf32> to vector<1x8x8xf32>
    %116 = arith.divf %112, %115 : vector<1x8x8xf32>
    %117 = vector.extract_strided_slice %45 {offsets = [0, 0, 24], sizes = [1, 8, 8], strides = [1, 1, 1]} : vector<1x8x32xf32> to vector<1x8x8xf32>
    "tpu.trace_start"() <{level = 10 : i32, message = "bqk,bkd->bqd"}> : () -> ()
    %cst_44 = arith.constant dense<0.000000e+00> : vector<1x8x8xf32>
    %118 = tpu.matmul %116, %117, %cst_44 {dimension_numbers = #tpu.dot_dimension_numbers<[2], [1], [1], [2], [0, 0, 0, 1, 1, 2], [0], [0]>} : vector<1x8x8xf32>, vector<1x8x8xf32>, vector<1x8x8xf32> -> vector<1x8x8xf32>
    "tpu.trace_stop"() : () -> ()
    %119 = tpu.concatenate %64, %82, %100, %118 in 2 : vector<1x8x8xf32>, vector<1x8x8xf32>, vector<1x8x8xf32>, vector<1x8x8xf32> -> vector<1x8x32xf32>
    %120 = vector.shape_cast %119 : vector<1x8x32xf32> to vector<8x32xf32>
    %c0_45 = arith.constant 0 : index
    %c0_46 = arith.constant 0 : index
    %121 = vector.load %arg7[%c0_45, %c0_46] : memref<32x32xf32, #tpu.memory_space<vmem>>, vector<32x32xf32>
    %cst_47 = arith.constant dense<0.000000e+00> : vector<8x32xf32>
    %122 = tpu.matmul %120, %121, %cst_47 {dimension_numbers = #tpu.dot_dimension_numbers<[1], [0], [0], [1], [0, 0, 1, 1], [], []>} : vector<8x32xf32>, vector<32x32xf32>, vector<8x32xf32> -> vector<8x32xf32>
    %c0_48 = arith.constant 0 : index
    %c0_49 = arith.constant 0 : index
    %123 = vector.load %arg8[%c0_48, %c0_49] : memref<1x32xf32, #tpu.memory_space<vmem>>, vector<1x32xf32>
    %124 = vector.broadcast %123 : vector<1x32xf32> to vector<8x32xf32>
    %125 = arith.addf %122, %124 : vector<8x32xf32>
    %126 = arith.addf %1, %125 : vector<8x32xf32>
    %c1 = arith.constant 1 : index
    %127 = memref.load %arg17[%c1] : memref<3xf32, #tpu.memory_space<smem>>
    %c1_50 = arith.constant 1 : index
    %128 = memref.load %arg18[%c1_50] : memref<3xf32, #tpu.memory_space<smem>>
    %cst_51 = arith.constant dense<0.000000e+00> : vector<8xf32>
    %129 = vector.multi_reduction <add>, %126, %cst_51 [1] : vector<8x32xf32> to vector<8xf32>
    %130 = vector.shape_cast %129 : vector<8xf32> to vector<8x1xf32>
    %cst_52 = arith.constant 3.200000e+01 : f32
    %131 = vector.broadcast %cst_52 : f32 to vector<8x1xf32>
    %132 = arith.divf %130, %131 : vector<8x1xf32>
    %133 = vector.broadcast %132 : vector<8x1xf32> to vector<8x32xf32>
    %134 = arith.subf %126, %133 : vector<8x32xf32>
    %135 = arith.mulf %134, %134 : vector<8x32xf32>
    %cst_53 = arith.constant dense<0.000000e+00> : vector<8xf32>
    %136 = vector.multi_reduction <add>, %135, %cst_53 [1] : vector<8x32xf32> to vector<8xf32>
    %137 = vector.shape_cast %136 : vector<8xf32> to vector<8x1xf32>
    %cst_54 = arith.constant 3.100000e+01 : f32
    %138 = vector.broadcast %cst_54 : f32 to vector<8x1xf32>
    %139 = arith.divf %137, %138 : vector<8x1xf32>
    %140 = math.sqrt %139 : vector<8x1xf32>
    %cst_55 = arith.constant 9.99999997E-7 : f32
    %141 = vector.broadcast %cst_55 : f32 to vector<8x1xf32>
    %142 = arith.addf %140, %141 : vector<8x1xf32>
    %143 = tpu.reciprocal %142 : vector<8x1xf32> -> vector<8x1xf32>
    %144 = vector.broadcast %127 : f32 to vector<8x32xf32>
    %145 = arith.mulf %144, %134 : vector<8x32xf32>
    %146 = vector.broadcast %143 : vector<8x1xf32> to vector<8x32xf32>
    %147 = arith.mulf %145, %146 : vector<8x32xf32>
    %148 = vector.broadcast %128 : f32 to vector<8x32xf32>
    %149 = arith.addf %147, %148 : vector<8x32xf32>
    %c0_56 = arith.constant 0 : index
    %c0_57 = arith.constant 0 : index
    %150 = vector.load %arg9[%c0_56, %c0_57] : memref<32x96xf32, #tpu.memory_space<vmem>>, vector<32x96xf32>
    %c0_58 = arith.constant 0 : index
    %c0_59 = arith.constant 0 : index
    %151 = vector.load %arg10[%c0_58, %c0_59] : memref<1x96xf32, #tpu.memory_space<vmem>>, vector<1x96xf32>
    %152 = vector.extract_strided_slice %150 {offsets = [0, 0], sizes = [32, 32], strides = [1, 1]} : vector<32x96xf32> to vector<32x32xf32>
    %cst_60 = arith.constant dense<0.000000e+00> : vector<8x32xf32>
    %153 = tpu.matmul %149, %152, %cst_60 {dimension_numbers = #tpu.dot_dimension_numbers<[1], [0], [0], [1], [0, 0, 1, 1], [], []>} : vector<8x32xf32>, vector<32x32xf32>, vector<8x32xf32> -> vector<8x32xf32>
    %154 = vector.extract_strided_slice %151 {offsets = [0, 0], sizes = [1, 32], strides = [1, 1]} : vector<1x96xf32> to vector<1x32xf32>
    %155 = vector.broadcast %154 : vector<1x32xf32> to vector<8x32xf32>
    %156 = arith.addf %153, %155 : vector<8x32xf32>
    %157 = vector.extract_strided_slice %150 {offsets = [0, 32], sizes = [32, 64], strides = [1, 1]} : vector<32x96xf32> to vector<32x64xf32>
    %cst_61 = arith.constant dense<0.000000e+00> : vector<16x64xf32>
    %158 = tpu.matmul %3, %157, %cst_61 {dimension_numbers = #tpu.dot_dimension_numbers<[1], [0], [0], [1], [0, 0, 1, 1], [], []>} : vector<16x32xf32>, vector<32x64xf32>, vector<16x64xf32> -> vector<16x64xf32>
    %159 = vector.extract_strided_slice %151 {offsets = [0, 32], sizes = [1, 64], strides = [1, 1]} : vector<1x96xf32> to vector<1x64xf32>
    %160 = vector.broadcast %159 : vector<1x64xf32> to vector<16x64xf32>
    %161 = arith.addf %158, %160 : vector<16x64xf32>
    %162 = vector.shape_cast %156 : vector<8x32xf32> to vector<1x8x32xf32>
    %163 = vector.extract_strided_slice %161 {offsets = [0, 0], sizes = [16, 32], strides = [1, 1]} : vector<16x64xf32> to vector<16x32xf32>
    %164 = vector.shape_cast %163 : vector<16x32xf32> to vector<1x16x32xf32>
    %165 = vector.extract_strided_slice %161 {offsets = [0, 32], sizes = [16, 32], strides = [1, 1]} : vector<16x64xf32> to vector<16x32xf32>
    %166 = vector.shape_cast %165 : vector<16x32xf32> to vector<1x16x32xf32>
    %167 = vector.shape_cast %11 : vector<8x16xi1> to vector<1x8x16xi1>
    %168 = vector.extract_strided_slice %162 {offsets = [0, 0, 0], sizes = [1, 8, 8], strides = [1, 1, 1]} : vector<1x8x32xf32> to vector<1x8x8xf32>
    %169 = vector.extract_strided_slice %164 {offsets = [0, 0, 0], sizes = [1, 16, 8], strides = [1, 1, 1]} : vector<1x16x32xf32> to vector<1x16x8xf32>
    "tpu.trace_start"() <{level = 10 : i32, message = "bqd,bkd->bqk"}> : () -> ()
    %cst_62 = arith.constant dense<0.000000e+00> : vector<1x8x16xf32>
    %170 = tpu.matmul %168, %169, %cst_62 {dimension_numbers = #tpu.dot_dimension_numbers<[2], [2], [1], [1], [0, 0, 0, 1, 1, 1], [0], [0]>} : vector<1x8x8xf32>, vector<1x16x8xf32>, vector<1x8x16xf32> -> vector<1x8x16xf32>
    "tpu.trace_stop"() : () -> ()
    %cst_63 = arith.constant 0.353553385 : f32
    %171 = vector.broadcast %cst_63 : f32 to vector<1x8x16xf32>
    %172 = arith.mulf %170, %171 : vector<1x8x16xf32>
    %cst_64 = arith.constant -1.000000e+09 : f32
    %173 = vector.broadcast %cst_64 : f32 to vector<1x8x16xf32>
    %174 = arith.select %167, %172, %173 : vector<1x8x16xi1>, vector<1x8x16xf32>
    %cst_65 = arith.constant dense<0xFF800000> : vector<1x8xf32>
    %175 = vector.multi_reduction <maximumf>, %174, %cst_65 [2] : vector<1x8x16xf32> to vector<1x8xf32>
    %176 = vector.shape_cast %175 : vector<1x8xf32> to vector<1x8x1xf32>
    %177 = vector.broadcast %176 : vector<1x8x1xf32> to vector<1x8x16xf32>
    %178 = arith.subf %174, %177 : vector<1x8x16xf32>
    %179 = math.exp %178 : vector<1x8x16xf32>
    %cst_66 = arith.constant dense<0.000000e+00> : vector<1x8xf32>
    %180 = vector.multi_reduction <add>, %179, %cst_66 [2] : vector<1x8x16xf32> to vector<1x8xf32>
    %181 = vector.shape_cast %180 : vector<1x8xf32> to vector<1x8x1xf32>
    %182 = vector.broadcast %181 : vector<1x8x1xf32> to vector<1x8x16xf32>
    %183 = arith.divf %179, %182 : vector<1x8x16xf32>
    %184 = vector.extract_strided_slice %166 {offsets = [0, 0, 0], sizes = [1, 16, 8], strides = [1, 1, 1]} : vector<1x16x32xf32> to vector<1x16x8xf32>
    "tpu.trace_start"() <{level = 10 : i32, message = "bqk,bkd->bqd"}> : () -> ()
    %cst_67 = arith.constant dense<0.000000e+00> : vector<1x8x8xf32>
    %185 = tpu.matmul %183, %184, %cst_67 {dimension_numbers = #tpu.dot_dimension_numbers<[2], [1], [1], [2], [0, 0, 0, 1, 1, 2], [0], [0]>} : vector<1x8x16xf32>, vector<1x16x8xf32>, vector<1x8x8xf32> -> vector<1x8x8xf32>
    "tpu.trace_stop"() : () -> ()
    %186 = vector.extract_strided_slice %162 {offsets = [0, 0, 8], sizes = [1, 8, 8], strides = [1, 1, 1]} : vector<1x8x32xf32> to vector<1x8x8xf32>
    %187 = vector.extract_strided_slice %164 {offsets = [0, 0, 8], sizes = [1, 16, 8], strides = [1, 1, 1]} : vector<1x16x32xf32> to vector<1x16x8xf32>
    "tpu.trace_start"() <{level = 10 : i32, message = "bqd,bkd->bqk"}> : () -> ()
    %cst_68 = arith.constant dense<0.000000e+00> : vector<1x8x16xf32>
    %188 = tpu.matmul %186, %187, %cst_68 {dimension_numbers = #tpu.dot_dimension_numbers<[2], [2], [1], [1], [0, 0, 0, 1, 1, 1], [0], [0]>} : vector<1x8x8xf32>, vector<1x16x8xf32>, vector<1x8x16xf32> -> vector<1x8x16xf32>
    "tpu.trace_stop"() : () -> ()
    %cst_69 = arith.constant 0.353553385 : f32
    %189 = vector.broadcast %cst_69 : f32 to vector<1x8x16xf32>
    %190 = arith.mulf %188, %189 : vector<1x8x16xf32>
    %cst_70 = arith.constant -1.000000e+09 : f32
    %191 = vector.broadcast %cst_70 : f32 to vector<1x8x16xf32>
    %192 = arith.select %167, %190, %191 : vector<1x8x16xi1>, vector<1x8x16xf32>
    %cst_71 = arith.constant dense<0xFF800000> : vector<1x8xf32>
    %193 = vector.multi_reduction <maximumf>, %192, %cst_71 [2] : vector<1x8x16xf32> to vector<1x8xf32>
    %194 = vector.shape_cast %193 : vector<1x8xf32> to vector<1x8x1xf32>
    %195 = vector.broadcast %194 : vector<1x8x1xf32> to vector<1x8x16xf32>
    %196 = arith.subf %192, %195 : vector<1x8x16xf32>
    %197 = math.exp %196 : vector<1x8x16xf32>
    %cst_72 = arith.constant dense<0.000000e+00> : vector<1x8xf32>
    %198 = vector.multi_reduction <add>, %197, %cst_72 [2] : vector<1x8x16xf32> to vector<1x8xf32>
    %199 = vector.shape_cast %198 : vector<1x8xf32> to vector<1x8x1xf32>
    %200 = vector.broadcast %199 : vector<1x8x1xf32> to vector<1x8x16xf32>
    %201 = arith.divf %197, %200 : vector<1x8x16xf32>
    %202 = vector.extract_strided_slice %166 {offsets = [0, 0, 8], sizes = [1, 16, 8], strides = [1, 1, 1]} : vector<1x16x32xf32> to vector<1x16x8xf32>
    "tpu.trace_start"() <{level = 10 : i32, message = "bqk,bkd->bqd"}> : () -> ()
    %cst_73 = arith.constant dense<0.000000e+00> : vector<1x8x8xf32>
    %203 = tpu.matmul %201, %202, %cst_73 {dimension_numbers = #tpu.dot_dimension_numbers<[2], [1], [1], [2], [0, 0, 0, 1, 1, 2], [0], [0]>} : vector<1x8x16xf32>, vector<1x16x8xf32>, vector<1x8x8xf32> -> vector<1x8x8xf32>
    "tpu.trace_stop"() : () -> ()
    %204 = vector.extract_strided_slice %162 {offsets = [0, 0, 16], sizes = [1, 8, 8], strides = [1, 1, 1]} : vector<1x8x32xf32> to vector<1x8x8xf32>
    %205 = vector.extract_strided_slice %164 {offsets = [0, 0, 16], sizes = [1, 16, 8], strides = [1, 1, 1]} : vector<1x16x32xf32> to vector<1x16x8xf32>
    "tpu.trace_start"() <{level = 10 : i32, message = "bqd,bkd->bqk"}> : () -> ()
    %cst_74 = arith.constant dense<0.000000e+00> : vector<1x8x16xf32>
    %206 = tpu.matmul %204, %205, %cst_74 {dimension_numbers = #tpu.dot_dimension_numbers<[2], [2], [1], [1], [0, 0, 0, 1, 1, 1], [0], [0]>} : vector<1x8x8xf32>, vector<1x16x8xf32>, vector<1x8x16xf32> -> vector<1x8x16xf32>
    "tpu.trace_stop"() : () -> ()
    %cst_75 = arith.constant 0.353553385 : f32
    %207 = vector.broadcast %cst_75 : f32 to vector<1x8x16xf32>
    %208 = arith.mulf %206, %207 : vector<1x8x16xf32>
    %cst_76 = arith.constant -1.000000e+09 : f32
    %209 = vector.broadcast %cst_76 : f32 to vector<1x8x16xf32>
    %210 = arith.select %167, %208, %209 : vector<1x8x16xi1>, vector<1x8x16xf32>
    %cst_77 = arith.constant dense<0xFF800000> : vector<1x8xf32>
    %211 = vector.multi_reduction <maximumf>, %210, %cst_77 [2] : vector<1x8x16xf32> to vector<1x8xf32>
    %212 = vector.shape_cast %211 : vector<1x8xf32> to vector<1x8x1xf32>
    %213 = vector.broadcast %212 : vector<1x8x1xf32> to vector<1x8x16xf32>
    %214 = arith.subf %210, %213 : vector<1x8x16xf32>
    %215 = math.exp %214 : vector<1x8x16xf32>
    %cst_78 = arith.constant dense<0.000000e+00> : vector<1x8xf32>
    %216 = vector.multi_reduction <add>, %215, %cst_78 [2] : vector<1x8x16xf32> to vector<1x8xf32>
    %217 = vector.shape_cast %216 : vector<1x8xf32> to vector<1x8x1xf32>
    %218 = vector.broadcast %217 : vector<1x8x1xf32> to vector<1x8x16xf32>
    %219 = arith.divf %215, %218 : vector<1x8x16xf32>
    %220 = vector.extract_strided_slice %166 {offsets = [0, 0, 16], sizes = [1, 16, 8], strides = [1, 1, 1]} : vector<1x16x32xf32> to vector<1x16x8xf32>
    "tpu.trace_start"() <{level = 10 : i32, message = "bqk,bkd->bqd"}> : () -> ()
    %cst_79 = arith.constant dense<0.000000e+00> : vector<1x8x8xf32>
    %221 = tpu.matmul %219, %220, %cst_79 {dimension_numbers = #tpu.dot_dimension_numbers<[2], [1], [1], [2], [0, 0, 0, 1, 1, 2], [0], [0]>} : vector<1x8x16xf32>, vector<1x16x8xf32>, vector<1x8x8xf32> -> vector<1x8x8xf32>
    "tpu.trace_stop"() : () -> ()
    %222 = vector.extract_strided_slice %162 {offsets = [0, 0, 24], sizes = [1, 8, 8], strides = [1, 1, 1]} : vector<1x8x32xf32> to vector<1x8x8xf32>
    %223 = vector.extract_strided_slice %164 {offsets = [0, 0, 24], sizes = [1, 16, 8], strides = [1, 1, 1]} : vector<1x16x32xf32> to vector<1x16x8xf32>
    "tpu.trace_start"() <{level = 10 : i32, message = "bqd,bkd->bqk"}> : () -> ()
    %cst_80 = arith.constant dense<0.000000e+00> : vector<1x8x16xf32>
    %224 = tpu.matmul %222, %223, %cst_80 {dimension_numbers = #tpu.dot_dimension_numbers<[2], [2], [1], [1], [0, 0, 0, 1, 1, 1], [0], [0]>} : vector<1x8x8xf32>, vector<1x16x8xf32>, vector<1x8x16xf32> -> vector<1x8x16xf32>
    "tpu.trace_stop"() : () -> ()
    %cst_81 = arith.constant 0.353553385 : f32
    %225 = vector.broadcast %cst_81 : f32 to vector<1x8x16xf32>
    %226 = arith.mulf %224, %225 : vector<1x8x16xf32>
    %cst_82 = arith.constant -1.000000e+09 : f32
    %227 = vector.broadcast %cst_82 : f32 to vector<1x8x16xf32>
    %228 = arith.select %167, %226, %227 : vector<1x8x16xi1>, vector<1x8x16xf32>
    %cst_83 = arith.constant dense<0xFF800000> : vector<1x8xf32>
    %229 = vector.multi_reduction <maximumf>, %228, %cst_83 [2] : vector<1x8x16xf32> to vector<1x8xf32>
    %230 = vector.shape_cast %229 : vector<1x8xf32> to vector<1x8x1xf32>
    %231 = vector.broadcast %230 : vector<1x8x1xf32> to vector<1x8x16xf32>
    %232 = arith.subf %228, %231 : vector<1x8x16xf32>
    %233 = math.exp %232 : vector<1x8x16xf32>
    %cst_84 = arith.constant dense<0.000000e+00> : vector<1x8xf32>
    %234 = vector.multi_reduction <add>, %233, %cst_84 [2] : vector<1x8x16xf32> to vector<1x8xf32>
    %235 = vector.shape_cast %234 : vector<1x8xf32> to vector<1x8x1xf32>
    %236 = vector.broadcast %235 : vector<1x8x1xf32> to vector<1x8x16xf32>
    %237 = arith.divf %233, %236 : vector<1x8x16xf32>
    %238 = vector.extract_strided_slice %166 {offsets = [0, 0, 24], sizes = [1, 16, 8], strides = [1, 1, 1]} : vector<1x16x32xf32> to vector<1x16x8xf32>
    "tpu.trace_start"() <{level = 10 : i32, message = "bqk,bkd->bqd"}> : () -> ()
    %cst_85 = arith.constant dense<0.000000e+00> : vector<1x8x8xf32>
    %239 = tpu.matmul %237, %238, %cst_85 {dimension_numbers = #tpu.dot_dimension_numbers<[2], [1], [1], [2], [0, 0, 0, 1, 1, 2], [0], [0]>} : vector<1x8x16xf32>, vector<1x16x8xf32>, vector<1x8x8xf32> -> vector<1x8x8xf32>
    "tpu.trace_stop"() : () -> ()
    %240 = tpu.concatenate %185, %203, %221, %239 in 2 : vector<1x8x8xf32>, vector<1x8x8xf32>, vector<1x8x8xf32>, vector<1x8x8xf32> -> vector<1x8x32xf32>
    %241 = vector.shape_cast %240 : vector<1x8x32xf32> to vector<8x32xf32>
    %c0_86 = arith.constant 0 : index
    %c0_87 = arith.constant 0 : index
    %242 = vector.load %arg11[%c0_86, %c0_87] : memref<32x32xf32, #tpu.memory_space<vmem>>, vector<32x32xf32>
    %cst_88 = arith.constant dense<0.000000e+00> : vector<8x32xf32>
    %243 = tpu.matmul %241, %242, %cst_88 {dimension_numbers = #tpu.dot_dimension_numbers<[1], [0], [0], [1], [0, 0, 1, 1], [], []>} : vector<8x32xf32>, vector<32x32xf32>, vector<8x32xf32> -> vector<8x32xf32>
    %c0_89 = arith.constant 0 : index
    %c0_90 = arith.constant 0 : index
    %244 = vector.load %arg12[%c0_89, %c0_90] : memref<1x32xf32, #tpu.memory_space<vmem>>, vector<1x32xf32>
    %245 = vector.broadcast %244 : vector<1x32xf32> to vector<8x32xf32>
    %246 = arith.addf %243, %245 : vector<8x32xf32>
    %247 = arith.addf %126, %246 : vector<8x32xf32>
    %c2 = arith.constant 2 : index
    %248 = memref.load %arg17[%c2] : memref<3xf32, #tpu.memory_space<smem>>
    %c2_91 = arith.constant 2 : index
    %249 = memref.load %arg18[%c2_91] : memref<3xf32, #tpu.memory_space<smem>>
    %cst_92 = arith.constant dense<0.000000e+00> : vector<8xf32>
    %250 = vector.multi_reduction <add>, %247, %cst_92 [1] : vector<8x32xf32> to vector<8xf32>
    %251 = vector.shape_cast %250 : vector<8xf32> to vector<8x1xf32>
    %cst_93 = arith.constant 3.200000e+01 : f32
    %252 = vector.broadcast %cst_93 : f32 to vector<8x1xf32>
    %253 = arith.divf %251, %252 : vector<8x1xf32>
    %254 = vector.broadcast %253 : vector<8x1xf32> to vector<8x32xf32>
    %255 = arith.subf %247, %254 : vector<8x32xf32>
    %256 = arith.mulf %255, %255 : vector<8x32xf32>
    %cst_94 = arith.constant dense<0.000000e+00> : vector<8xf32>
    %257 = vector.multi_reduction <add>, %256, %cst_94 [1] : vector<8x32xf32> to vector<8xf32>
    %258 = vector.shape_cast %257 : vector<8xf32> to vector<8x1xf32>
    %cst_95 = arith.constant 3.100000e+01 : f32
    %259 = vector.broadcast %cst_95 : f32 to vector<8x1xf32>
    %260 = arith.divf %258, %259 : vector<8x1xf32>
    %261 = math.sqrt %260 : vector<8x1xf32>
    %cst_96 = arith.constant 9.99999997E-7 : f32
    %262 = vector.broadcast %cst_96 : f32 to vector<8x1xf32>
    %263 = arith.addf %261, %262 : vector<8x1xf32>
    %264 = tpu.reciprocal %263 : vector<8x1xf32> -> vector<8x1xf32>
    %265 = vector.broadcast %248 : f32 to vector<8x32xf32>
    %266 = arith.mulf %265, %255 : vector<8x32xf32>
    %267 = vector.broadcast %264 : vector<8x1xf32> to vector<8x32xf32>
    %268 = arith.mulf %266, %267 : vector<8x32xf32>
    %269 = vector.broadcast %249 : f32 to vector<8x32xf32>
    %270 = arith.addf %268, %269 : vector<8x32xf32>
    %c0_97 = arith.constant 0 : index
    %c0_98 = arith.constant 0 : index
    %271 = vector.load %arg13[%c0_97, %c0_98] : memref<32x64xf32, #tpu.memory_space<vmem>>, vector<32x64xf32>
    %cst_99 = arith.constant dense<0.000000e+00> : vector<8x64xf32>
    %272 = tpu.matmul %270, %271, %cst_99 {dimension_numbers = #tpu.dot_dimension_numbers<[1], [0], [0], [1], [0, 0, 1, 1], [], []>} : vector<8x32xf32>, vector<32x64xf32>, vector<8x64xf32> -> vector<8x64xf32>
    %c0_100 = arith.constant 0 : index
    %c0_101 = arith.constant 0 : index
    %273 = vector.load %arg14[%c0_100, %c0_101] : memref<1x64xf32, #tpu.memory_space<vmem>>, vector<1x64xf32>
    %274 = vector.broadcast %273 : vector<1x64xf32> to vector<8x64xf32>
    %275 = arith.addf %272, %274 : vector<8x64xf32>
    %cst_102 = arith.constant 0.000000e+00 : f32
    %276 = vector.broadcast %cst_102 : f32 to vector<8x64xf32>
    %277 = arith.maximumf %275, %276 : vector<8x64xf32>
    %c0_103 = arith.constant 0 : index
    %c0_104 = arith.constant 0 : index
    %278 = vector.load %arg15[%c0_103, %c0_104] : memref<64x32xf32, #tpu.memory_space<vmem>>, vector<64x32xf32>
    %cst_105 = arith.constant dense<0.000000e+00> : vector<8x32xf32>
    %279 = tpu.matmul %277, %278, %cst_105 {dimension_numbers = #tpu.dot_dimension_numbers<[1], [0], [0], [1], [0, 0, 1, 1], [], []>} : vector<8x64xf32>, vector<64x32xf32>, vector<8x32xf32> -> vector<8x32xf32>
    %c0_106 = arith.constant 0 : index
    %c0_107 = arith.constant 0 : index
    %280 = vector.load %arg16[%c0_106, %c0_107] : memref<1x32xf32, #tpu.memory_space<vmem>>, vector<1x32xf32>
    %281 = vector.broadcast %280 : vector<1x32xf32> to vector<8x32xf32>
    %282 = arith.addf %279, %281 : vector<8x32xf32>
    %283 = arith.addf %247, %282 : vector<8x32xf32>
    %284 = vector.shape_cast %283 : vector<8x32xf32> to vector<1x8x32xf32>
    %c0_108 = arith.constant 0 : index
    %c0_109 = arith.constant 0 : index
    %c0_110 = arith.constant 0 : index
    %285 = vector.load %arg19[%c0_108, %c0_109, %c0_110] : memref<1x8x32xf32, #tpu.memory_space<vmem>>, vector<1x8x32xf32>
    tpu.vector_store %arg19[%c0_108, %c0_109, %c0_110], %284 {strides = array<i32>} : memref<1x8x32xf32, #tpu.memory_space<vmem>>, vector<1x8x32xf32>,
    return
  }
  func.func @transform_0(%arg0: i32) -> (i32, i32, i32) {
    %c0_i32 = arith.constant 0 : i32
    %c0_i32_0 = arith.constant 0 : i32
    %c0_i32_1 = arith.constant 0 : i32
    return %arg0, %c0_i32, %c0_i32_0 : i32, i32, i32
  }
  func.func @transform_1(%arg0: i32) -> (i32, i32, i32) {
    %c0_i32 = arith.constant 0 : i32
    %c0_i32_0 = arith.constant 0 : i32
    %c0_i32_1 = arith.constant 0 : i32
    return %arg0, %c0_i32, %c0_i32_0 : i32, i32, i32
  }
  func.func @transform_2(%arg0: i32) -> (i32, i32) {
    %c0_i32 = arith.constant 0 : i32
    %c0_i32_0 = arith.constant 0 : i32
    %c0_i32_1 = arith.constant 0 : i32
    return %c0_i32, %c0_i32_0 : i32, i32
  }
  func.func @transform_3(%arg0: i32) -> (i32, i32) {
    %c0_i32 = arith.constant 0 : i32
    %c0_i32_0 = arith.constant 0 : i32
    %c0_i32_1 = arith.constant 0 : i32
    return %c0_i32, %c0_i32_0 : i32, i32
  }
  func.func @transform_4(%arg0: i32) -> (i32, i32) {
    %c0_i32 = arith.constant 0 : i32
    %c0_i32_0 = arith.constant 0 : i32
    %c0_i32_1 = arith.constant 0 : i32
    return %c0_i32, %c0_i32_0 : i32, i32
  }
  func.func @transform_5(%arg0: i32) -> (i32, i32) {
    %c0_i32 = arith.constant 0 : i32
    %c0_i32_0 = arith.constant 0 : i32
    %c0_i32_1 = arith.constant 0 : i32
    return %c0_i32, %c0_i32_0 : i32, i32
  }
  func.func @transform_6(%arg0: i32) -> (i32, i32) {
    %c0_i32 = arith.constant 0 : i32
    %c0_i32_0 = arith.constant 0 : i32
    %c0_i32_1 = arith.constant 0 : i32
    return %c0_i32, %c0_i32_0 : i32, i32
  }
  func.func @transform_7(%arg0: i32) -> (i32, i32) {
    %c0_i32 = arith.constant 0 : i32
    %c0_i32_0 = arith.constant 0 : i32
    %c0_i32_1 = arith.constant 0 : i32
    return %c0_i32, %c0_i32_0 : i32, i32
  }
  func.func @transform_8(%arg0: i32) -> (i32, i32) {
    %c0_i32 = arith.constant 0 : i32
    %c0_i32_0 = arith.constant 0 : i32
    %c0_i32_1 = arith.constant 0 : i32
    return %c0_i32, %c0_i32_0 : i32, i32
  }
  func.func @transform_9(%arg0: i32) -> (i32, i32) {
    %c0_i32 = arith.constant 0 : i32
    %c0_i32_0 = arith.constant 0 : i32
    %c0_i32_1 = arith.constant 0 : i32
    return %c0_i32, %c0_i32_0 : i32, i32
  }
  func.func @transform_10(%arg0: i32) -> (i32, i32) {
    %c0_i32 = arith.constant 0 : i32
    %c0_i32_0 = arith.constant 0 : i32
    %c0_i32_1 = arith.constant 0 : i32
    return %c0_i32, %c0_i32_0 : i32, i32
  }
  func.func @transform_11(%arg0: i32) -> (i32, i32) {
    %c0_i32 = arith.constant 0 : i32
    %c0_i32_0 = arith.constant 0 : i32
    %c0_i32_1 = arith.constant 0 : i32
    return %c0_i32, %c0_i32_0 : i32, i32
  }
  func.func @transform_12(%arg0: i32) -> (i32, i32) {
    %c0_i32 = arith.constant 0 : i32
    %c0_i32_0 = arith.constant 0 : i32
    %c0_i32_1 = arith.constant 0 : i32
    return %c0_i32, %c0_i32_0 : i32, i32
  }
  func.func @transform_13(%arg0: i32) -> (i32, i32) {
    %c0_i32 = arith.constant 0 : i32
    %c0_i32_0 = arith.constant 0 : i32
    %c0_i32_1 = arith.constant 0 : i32
    return %c0_i32, %c0_i32_0 : i32, i32
  }
  func.func @transform_14(%arg0: i32) -> (i32, i32) {
    %c0_i32 = arith.constant 0 : i32
    %c0_i32_0 = arith.constant 0 : i32
    %c0_i32_1 = arith.constant 0 : i32
    return %c0_i32, %c0_i32_0 : i32, i32
  }
  func.func @transform_15(%arg0: i32) -> (i32, i32) {
    %c0_i32 = arith.constant 0 : i32
    %c0_i32_0 = arith.constant 0 : i32
    %c0_i32_1 = arith.constant 0 : i32
    return %c0_i32, %c0_i32_0 : i32, i32
  }
  func.func @transform_16(%arg0: i32) -> i32 {
    %c0_i32 = arith.constant 0 : i32
    %c0_i32_0 = arith.constant 0 : i32
    return %c0_i32 : i32
  }
  func.func @transform_17(%arg0: i32) -> i32 {
    %c0_i32 = arith.constant 0 : i32
    %c0_i32_0 = arith.constant 0 : i32
    return %c0_i32 : i32
  }
  func.func @transform_18(%arg0: i32) -> (i32, i32, i32) {
    %c0_i32 = arith.constant 0 : i32
    %c0_i32_0 = arith.constant 0 : i32
    %c0_i32_1 = arith.constant 0 : i32
    return %arg0, %c0_i32, %c0_i32_0 : i32, i32, i32
  }
}

</mosaic_0001>

<bundles_post_ra>
// kernel: tpu_custom_call.1
= control target key start
LH: loop header
LB: loop body
LE: loop exit
PB: predicated region body
PF: predicated region fallthrough
CT: control target
= control target key end

     0   :  { %s3121_s0 = inlined_call_operand.hbm [shape: f32[2,8,32], index: 0, kind: input, shape index: {}]   ;;  %s3122_s1 = inlined_call_operand.vmem [shape: f32[2,16,32], index: 1, kind: input, shape index: {}]   ;;  %s3123_s2 = inlined_call_operand.hbm [shape: s8[8,8], index: 2, kind: input, shape index: {}]   ;;  %s3124_s3 = inlined_call_operand.hbm [shape: s8[8,16], index: 3, kind: input, shape index: {}]   ;;  %s3125_s4 = inlined_call_operand.vmem [shape: f32[32,96], index: 4, kind: input, shape index: {}]   ;;  %s3126_s5 = inlined_call_operand.vmem [shape: f32[1,96], index: 5, kind: input, shape index: {}]   ;;  %s3127_s6 = inlined_call_operand.vmem [shape: f32[32,32], index: 6, kind: input, shape index: {}]   ;;  %s3128_s7 = inlined_call_operand.vmem [shape: f32[1,32], index: 7, kind: input, shape index: {}]   ;;  %s3129_s8 = inlined_call_operand.hbm [shape: f32[32,96], index: 8, kind: input, shape index: {}]   ;;  %s3130_s9 = inlined_call_operand.vmem [shape: f32[1,96], index: 9, kind: input, shape index: {}]   ;;  %s3131_s10 = inlined_call_operand.hbm [shape: f32[32,32], index: 10, kind: input, shape index: {}]   ;;  %s3132_s11 = inlined_call_operand.vmem [shape: f32[1,32], index: 11, kind: input, shape index: {}]   ;;  %s3133_s12 = inlined_call_operand.hbm [shape: f32[32,64], index: 12, kind: input, shape index: {}]   ;;  %s3134_s13 = inlined_call_operand.vmem [shape: f32[1,64], index: 13, kind: input, shape index: {}]   ;;  %s3135_s14 = inlined_call_operand.vmem [shape: f32[64,32], index: 14, kind: input, shape index: {}]   ;;  %s3136_s15 = inlined_call_operand.vmem [shape: f32[1,32], index: 15, kind: input, shape index: {}]   ;;  %s3137_s16 = inlined_call_operand.vmem [shape: f32[3], index: 16, kind: input, shape index: {}]   ;;  %s3138_s17 = inlined_call_operand.vmem [shape: f32[3], index: 17, kind: input, shape index: {}]   ;;  %s3139_s18 = inlined_call_operand.hbm [shape: f32[2,8,32], index: 18, kind: output, shape index: {}]  }
   0x1   :  { %3148 = sst [smem:[#allocation25_spill]] %s3121_s0 }
   0x2   :  { %3149 = sst [smem:[#allocation26_spill]] %s3122_s1 }
   0x3   :  { %3150 = sst [smem:[#allocation27_spill]] %s3123_s2 }
   0x4   :  { %3151 = sst [smem:[#allocation28_spill]] %s3124_s3 }
   0x5   :  { %3152 = sst [smem:[#allocation29_spill]] %s3129_s8 }
   0x6   :  { %3153 = sst [smem:[#allocation30_spill]] %s3131_s10 }
   0x7   :  { %3154 = sst [smem:[#allocation31_spill]] %s3132_s11 }
   0x8   :  { %3155 = sst [smem:[#allocation32_spill]] %s3133_s12 }
   0x9   :  { %3156 = sst [smem:[#allocation33_spill]] %s3134_s13 }
   0xa   :  { %3157 = sst [smem:[#allocation34_spill]] %s3135_s14 }
   0xb   :  { %3158 = sst [smem:[#allocation35_spill]] %s3136_s15 }
   0xc   :  { %3159 = sst [smem:[#allocation36_spill]] %s3137_s16 }
   0xd   :  { %3160 = sst [smem:[#allocation37_spill]] %s3139_s18 }
   0xe   :  { %23 = vsyncpa [#allocation3], 0 }
   0xf   :  { %25 = vsyncpa [#allocation3 + $0x1], 0 }
  0x10   :  { %26 = vsyncpa [#allocation7], 0 }
  0x11   :  { %27 = vsyncpa [#allocation10], 0 }
  0x12   :  { %28 = vsyncpa [#allocation13], 0 }
  0x13   :  { %29 = vsyncpa [#allocation5], 0 }
  0x14   :  { %30 = vsyncpa [#allocation16], 0 }
  0x15   :  { %31 = vsyncpa [#allocation4], 0 }
  0x16   :  { %33 = vsyncpa [#allocation4 + $0x1], 0  ;;  %s2690_s27 = smov 0   ;;  %s2692_s28 = smov 0  }
  0x17   :  { %s2694_s29 = smov 0   ;;  %s2696_s30 = smov 0  }
  0x18 LB: > { %s3161_s1 = sld [smem:[#allocation27_spill]]  ;;  %s2714_s21 = sadd.s32 4294967295, %s2568_s30   ;;  %s2568_s30 = sphi %s2696_s30, %s3193_s30   ;;  %s2564_s29 = sphi %s2694_s29, %s3192_s29   ;;  %s2560_s28 = sphi %s2692_s28, %s3191_s28   ;;  %s2556_s27 = sphi %s2690_s27, %s3190_s27  }
  0x19   : > { %p1985_p0 = scmp.ge.s32.totalorder %s2568_s30, 1  ;;  %p60_p1 = scmp.eq.s32.totalorder %s2714_s21, 0 }
  0x1a   : > { %p458_p2 = scmp.lt.s32.totalorder %s2568_s30, 3  ;;  %s2570_s2 = smov [#allocation6]  }
  0x1b   : > { %s472_s23 = sshll.u32 %s2570_s2, 4  ;;  %s3163_s8 = sld [smem:[#allocation29_spill]]  ;;  %s473_s23 = int_to_ptr.vmem [resolvable:$true] %s472_s23 }
  0x1c   : > { %p2719_p3 = pnand %p1985_p0, %p458_p2  ;;  %s2571_s19 = smov [#allocation9]  }
  0x1d   : > { %s2572_s2 = smov 128   ;;  %s2573_s18 = smov 8  }
  0x1e   : > { %s470_s20 = sshll.u32 %s3161_s1, 4  ;;  %p2085_p5 = pneg %p2719_p3  ;;  %s471_s20 = int_to_ptr.hbm [resolvable:$true] %s470_s20 }
  0x1f   : > { %s507_s1 = sshll.u32 %s2571_s19, 4  ;;  %s3165_s3 = sld [smem:[#allocation28_spill]]  ;;  %s508_s1 = int_to_ptr.vmem [resolvable:$true] %s507_s1 }
  0x20   : > { %p2731_p6 = pnand %p2085_p5, %p60_p1  ;;  %s2574_s15 = smov [#allocation8]  }
  0x21   : > { %s505_s26 = sshll.u32 %s3163_s8, 4  ;;  %s484_s13 = sshll.u32 %s2574_s15, 4  ;;  %s506_s26 = int_to_ptr.hbm [resolvable:$true] %s505_s26  ;;  %s485_s13 = int_to_ptr.vmem [resolvable:$true] %s484_s13 }
  0x22   : > { %2088 = dma.hbm_to_vmem [thread:$0]  (!%p2731_p6), %s471_s20, 32, %s473_s23, [#allocation7]  }
  0x23   : > { %2094 = dma.hbm_to_vmem [thread:$0]  (!%p2731_p6), %s506_s26, 512, %s508_s1, [#allocation10], %s2572_s2, %s2572_s2, %s2573_s18  }
  0x24   : > { %s3166_s10 = sld [smem:[#allocation30_spill]]  ;;  %s2575_s20 = smov [#allocation11]  }
  0x25   : > { %s482_s8 = sshll.u32 %s3165_s3, 4  ;;  %s524_s23 = sshll.u32 %s2575_s20, 4  ;;  %s483_s8 = int_to_ptr.hbm [resolvable:$true] %s482_s8  ;;  %s525_s23 = int_to_ptr.vmem [resolvable:$true] %s524_s23 }
  0x26   : > { %2091 = dma.hbm_to_vmem [thread:$0]  (!%p2731_p6), %s483_s8, 32, %s485_s13, [#allocation7]  }
  0x27   : > { %s3167_s12 = sld [smem:[#allocation32_spill]]  ;;  %s2576_s13 = smov [#allocation12]  }
  0x28   : > { %s3168_s16 = sld [smem:[#allocation36_spill]]  ;;  %s541_s15 = sshll.u32 %s2576_s13, 4  ;;  %s542_s15 = int_to_ptr.vmem [resolvable:$true] %s541_s15 }
  0x29   : > { %s2577_s25 = smov [#allocation14]   ;;  %s2578_s26 = smov [#allocation15]  }
  0x2a   : > { %s522_s19 = sshll.u32 %s3166_s10, 4  ;;  %s1984_s1 = sadd.s32 4294967294, %s2568_s30   ;;  %s523_s19 = int_to_ptr.hbm [resolvable:$true] %s522_s19 }
  0x2b   : > { %2097 = dma.hbm_to_vmem [thread:$0]  (!%p2731_p6), %s523_s19, 512, %s525_s23, [#allocation10], %s2572_s2, %s2572_s2, %s2573_s18  }
  0x2c   : > { %s573_s23 = sshll.u32 %s3138_s17, 4  ;;  %s2766_s11 = sadd.s32 1, %s2568_s30   ;;  %s574_s23 = int_to_ptr.vmem [resolvable:$true] %s573_s23 }
  0x2d   : > { %s539_s24 = sshll.u32 %s3167_s12, 4  ;;  %p53_p7 = scmp.ne.s32.totalorder %s2564_s29, %s2560_s28  ;;  %s540_s24 = int_to_ptr.hbm [resolvable:$true] %s539_s24 }
  0x2e   : > { %s563_s8 = sshll.u32 %s3168_s16, 4  ;;  %p54_p9 = scmp.eq.s32.totalorder %s2568_s30, 0  ;;  %s564_s8 = int_to_ptr.vmem [resolvable:$true] %s563_s8 }
  0x2f   : > { %2100 = dma.hbm_to_vmem [thread:$0]  (!%p2731_p6), %s540_s24, 512, %s542_s15, [#allocation13], %s2572_s2, %s2572_s2, %s2573_s18  }
  0x30   : > { %2103 = dma.vmem_to_smem (!%p2731_p6), %s564_s8, 16, %s2577_s25, [#allocation5]  }
  0x31   : > { %2106 = dma.vmem_to_smem (!%p2731_p6), %s574_s23, 16, %s2578_s26, [#allocation16]  }
  0x32   : > { %s46_s18 = sadd.s32 1, %s2564_s29  ;;  %s43_s2 = ssub.s32 %s2568_s30, %s2766_s11 }
  0x33   : > { %p44_p8 = scmp.eq.s32.totalorder %s43_s2, 0  ;;  %p59_p10 = scmp.ne.s32.totalorder %s2560_s28, %s2556_s27 }
  0x34   : > { %p445_p11 = scmp.eq.s32.totalorder %s2714_s21, 1  ;;  %p451_p0 = scmp.eq.s32.totalorder %s1984_s1, 1 }
  0x35   : > { %s2778_s24 = scalar_select %p44_p8, %s2564_s29, %s46_s18  }
  0x36   : > { %p2782_p12 = por %p60_p1, %p59_p10  ;;  %p2786_p13 = por %p445_p11, %p53_p7 }
  0x37   : > { %p55_p2 = por %p54_p9, %p53_p7  ;;  %s584_s8 = sand.u32 1, %s2564_s29  }
  0x38   : > { %p2791_p5 = por %p451_p0, %p59_p10  ;;  %p2122_p6 = scmp.lt.s32.totalorder %s2568_s30, 2 }
  0x39   : > { %s1994_s15 = sshll.u32 %s584_s8, 3  ;;  %s1995_s25 = sshll.u32 %s2568_s30, 3 }
  0x3a   : > { %s3172_s23 = sld [smem:[#allocation25_spill]]  ;;  %s588_s2 = scalar_lea.vmem [#allocation2], %s1994_s15 }
  0x3b   : > { %s596_s3 = sshll.u32 %s588_s2, 4  ;;  %p2800_p8 = pnand %p2122_p6, %p55_p2  ;;  %s597_s3 = int_to_ptr.vmem [resolvable:$true] %s596_s3 }
  0x3c   : > { %s585_s10 = scalar_lea.sflag [#allocation3], %s584_s8 }
  0x3d   : > { %p2456_p9 = pneg %p2800_p8 }
  0x40   : > { %s592_s26 = scalar_lea.hbm %s3172_s23, %s1995_s25  ;;  %s2459_s15 = scalar_lea.hbm %s3172_s23, 16 }
  0x41   : > { %s594_s18 = sshll.u32 %s592_s26, 4  ;;  %s595_s18 = int_to_ptr.hbm [resolvable:$true] %s594_s18 }
  0x42   : > { %s2452_s12 = sshra.s32 %s595_s18, 4  ;;  %s2453_s12 = int_to_ptr.hbm [resolvable:$true] %s2452_s12 }
  0x43   : > { %s2454_s16 = scalar_lea.hbm %s2453_s12, 8  ;;  %p2460_p0 = scmp.lt.s32.totalorder %s2453_s12, %s3172_s23 }
  0x44   : > { %p2455_p7 = scmp.ne.s32.totalorder %s2453_s12, %s2454_s16  ;;  %p2461_p2 = scmp.lt.s32.totalorder %s2459_s15, %s2454_s16 }
  0x46   : > { %p2457_p10 = pnand %p2456_p9, %p2455_p7  ;;  %p2462_p6 = por %p2461_p2, %p2460_p0 }
  0x48   : > { %p2458_p11 = pneg %p2457_p10 }
  0x4a   : > { %p2463_p4 = pnand %p2462_p6, %p2458_p11 }
  0x4c   : > { %2466 = shalt.err (!%p2463_p4)
}
  0x4d   : > { %2110 = dma.hbm_to_vmem [thread:$0]  (!%p2800_p8), %s595_s18, 128, %s597_s3, %s585_s10  }
  0x4e   : > { %613 = sbr.rel (%p2719_p3) target bundleno = 3952 (0xf70), region = 92  ;;  %s2817_s8 = sand.u32 (!%p2719_p3), 1, %s2560_s28  }
  0x4f   : > { %s3143_s2 = sshll.u32 (!%p2719_p3), %s2817_s8, 3  ;;  %s616_s25 = scalar_lea.sflag (!%p2719_p3), [#allocation3], %s2817_s8 }
  0x50   : > { %s619_s12 = scalar_lea.vmem (!%p2719_p3), [#allocation2], %s3143_s2 }
  0x53   : > { %2527 = dma.done.wait (%p2782_p12), %s616_s25, 128  }
  0x54   : > { %2529 = vsyncadd (%p2782_p12), %s616_s25, 4294967168 }
  0x55   : > { %2531 = dma.done.wait (%p60_p1), [#allocation7], 64  }
  0x56   : > { %2533 = vsyncadd (%p60_p1), [#allocation7], 4294967232 }
  0x57   : > { %2535 = dma.done.wait (%p60_p1), [#allocation10], 1024  }
  0x58   : > { %2537 = vsyncadd (%p60_p1), [#allocation10], 4294966272 }
  0x59   : > { %2539 = dma.done.wait (%p60_p1), [#allocation13], 512  }
  0x5a   : > { %2541 = vsyncadd (%p60_p1), [#allocation13], 4294966784 }
  0x5b   : > { %2543 = dma.done.wait (%p60_p1), [#allocation5], 16  }
  0x5c   : > { %2545 = vsyncadd (%p60_p1), [#allocation5], 4294967280 }
  0x5d   : > { %2547 = dma.done.wait (%p60_p1), [#allocation16], 16  }
  0x5e   : > { %2549 = vsyncadd (%p60_p1), [#allocation16], 4294967280 }
  0x5f   : > { %660 = sfence }
  0x60   : > { %v2847_v0 = vld [vmem:[%s619_s12] sm:$0xff]  ;;  %vm730_vm0 = vcmask 261120   ;;  %v2579_v2 = vmov 32.0   ;;  %v2580_v14 = vmov 31.0   ;;  %v790_v18 = vld [vmem:[%s3125_s4 + $0x18] sm:$0xff]  ;;  %v789_v19 = vld [vmem:[%s3125_s4 + $0x10] sm:$0xff] }
  0x61   : > { %v731_v1 = vsel %vm730_vm0, %v2847_v0, 0.0  ;;  %2224 = vrcp.f32 %v2579_v2  ;;  %810 = vmatpush.msra.mxu0 %v790_v18  ;;  %v788_v21 = vld [vmem:[%s3125_s4 + $0x8] sm:$0xff]  ;;  %v787_v22 = vld [vmem:[%s3125_s4] sm:$0xff]  ;;  %s728_s15 = sld [smem:[#allocation14]]  ;;  %s2581_s12 = smov 64   ;;  %vm821_vm9 = vcmask 64512  }
  0x62   : > { %732 = vadd.xlane.f32.xlu0 %v731_v1  ;;  %2226 = vrcp.f32 %v2580_v14  ;;  %s729_s20 = sld [smem:[#allocation15]]  ;;  %v2218_v53 = vld [vmem:[%s3126_s5] ss:$0 sm:$0xff]  ;;  %s2582_s3 = smov 120   ;;  %v722_v60 = vld [vmem:[#allocation6] sm:$0x3] }
  0x63   : > { %811 = vmatpush.msra.mxu0 %v789_v19  ;;  %s2583_s10 = smov 96   ;;  %s3146_s16 = smov 72   ;;  %v723_v61 = vunpack.c.0.s8 %v722_v60 }
  0x64   : > { %s2585_s22 = smov 88   ;;  %s2586_s0 = smov 56  }
  0x65   : > { %812 = vmatpush.msra.mxu0 %v788_v21  ;;  %vm2891_vm10 = vcmp.ne.s32.totalorder %v723_v61, 0  ;;  %s3144_s18 = smov 80   ;;  %s2588_s1 = smov 104  }
  0x66   : > { %s2589_s19 = smov 112   ;;  %s2592_s26 = smov 40  }
  0x67   : > { %v2225_v3 = vpop.eup %2224  ;;  %813 = vmatpush.msra.mxu0 %v787_v22  ;;  %v782_v44 = vstv %s728_s15  ;;  %s2590_s15 = smov 48   ;;  %s3147_s25 = smov 16  }
  0x68   : > { %v735_v4 = vmul.f32 32.0, %v2225_v3  ;;  %vm739_vm1 = vweird.f32 %v2225_v3  ;;  %v2227_v15 = vpop.eup %2226  ;;  %v785_v50 = vstv %s729_s20  ;;  %s3145_s20 = smov 8   ;;  %p714_p1 = scmp.lt.s32.totalorder %s2714_s21, 1 }
  0x69   : > { %v748_v16 = vmul.f32 31.0, %v2227_v15  ;;  %vm752_vm2 = vweird.f32 %v2227_v15 }
  0x6a   : > { %v736_v5 = vsub.f32 1.0, %v735_v4 }
  0x6b   : > { %v749_v17 = vsub.f32 1.0, %v748_v16 }
  0x6c   : > { %v737_v6 = vmul.f32 %v2225_v3, %v736_v5 }
  0x6d   : > { %v750_v20 = vmul.f32 %v2227_v15, %v749_v17 }
  0x6e   : > { %v738_v7 = vadd.f32 %v2225_v3, %v737_v6 }
  0x6f   : > { %v751_v23 = vadd.f32 %v2227_v15, %v750_v20 }
  0x70   : > { %v2851_v8 = vsel %vm739_vm1, %v2225_v3, %v738_v7 }
  0x71   : > { %v2868_v24 = vsel %vm752_vm2, %v2227_v15, %v751_v23 }
  0xd5   : > { %v733_v9 = vpop.xlane.xlu0 %732 }
  0xd6   : > { %v741_v10 = vmul.f32 %v2851_v8, %v733_v9 }
  0xd8   : > { %v742_v11 = vsub.f32 %v2847_v0, %v741_v10 }
  0xda   : > { %v743_v12 = vmul.f32 %v742_v11, %v742_v11  ;;  %v783_v47 = vmul.f32 %v782_v44, %v742_v11 }
  0xdc   : > { %v744_v13 = vsel %vm730_vm0, %v743_v12, 0.0 }
  0xdd   : > { %745 = vadd.xlane.f32.xlu0 %v744_v13 }
 0x150   : > { %v746_v25 = vpop.xlane.xlu0 %745 }
 0x151   : > { %v754_v26 = vmul.f32 %v2868_v24, %v746_v25 }
 0x153   : > { %2228 = vrsqrt.f32 %v754_v26  ;;  %vm762_vm3 = vcmp.eq.f32.partialorder %v754_v26, inf  ;;  %v765_v34 = vand.u32 2147483648, %v754_v26  ;;  %vm764_vm4 = vcmp.eq.f32.partialorder %v754_v26, 0.0 }
 0x159   : > { %v2229_v27 = vpop.eup %2228 }
 0x15a   : > { %v756_v28 = vmul.f32 %v2229_v27, %v754_v26 }
 0x15c   : > { %v757_v29 = vmul.f32 %v2229_v27, %v756_v28 }
 0x15e   : > { %v758_v30 = vmul.f32 0.5, %v757_v29 }
 0x160   : > { %v759_v31 = vsub.f32 1.5, %v758_v30 }
 0x162   : > { %v760_v32 = vmul.f32 %v2229_v27, %v759_v31 }
 0x164   : > { %v761_v33 = vmul.f32 %v760_v32, %v754_v26 }
 0x166   : > { %v763_v35 = vsel %vm762_vm3, %v754_v26, %v761_v33 }
 0x167   : > { %v766_v36 = vsel %vm764_vm4, %v765_v34, %v763_v35 }
 0x168   : > { %v767_v37 = vadd.f32 1e-06, %v766_v36 }
 0x16a   : > { %2230 = vrcp.f32 %v767_v37  ;;  %v779_v41 = vand.u32 2147483648, %v767_v37  ;;  %v777_v43 = vand.u32 2147483647, %v767_v37  ;;  %vm773_vm6 = vweird.f32 %v767_v37 }
 0x16c   : > { %v780_v46 = vor.u32 1.1754944e-38, %v779_v41  ;;  %vm778_vm8 = vcmp.eq.f32.partialorder %v777_v43, 8.507059e+37 }
 0x170   : > { %v2231_v38 = vpop.eup %2230 }
 0x171   : > { %v769_v39 = vmul.f32 %v2231_v38, %v767_v37  ;;  %vm774_vm5 = vweird.f32 %v2231_v38 }
 0x172   : > { %vm775_vm7 = vmor %vm773_vm6, %vm774_vm5 }
 0x173   : > { %v770_v40 = vsub.f32 1.0, %v769_v39 }
 0x175   : > { %v771_v42 = vmul.f32 %v2231_v38, %v770_v40 }
 0x177   : > { %v772_v45 = vadd.f32 %v2231_v38, %v771_v42 }
 0x179   : > { %v776_v48 = vsel %vm775_vm7, %v2231_v38, %v772_v45 }
 0x17a   : > { %v781_v49 = vsel %vm778_vm8, %v780_v46, %v776_v48 }
 0x17b   : > { %v784_v51 = vmul.f32 %v783_v47, %v781_v49 }
 0x17d   : > { %v786_v52 = vadd.f32 %v785_v50, %v784_v51 }
 0x17f   : > { %2008 = vmatmul.msk.f32.vlgmr.msra.gmra.mxu0 %vm730_vm0, %v786_v52 }
 0x1fc   : > { %v815_v54 = vpop.f32.mrf.mxu0 }
 0x1fd   : > { %v2875_v55 = vadd.f32 %v2218_v53, %v815_v54 }
 0x1ff   : > { %872 = vrot.lane.b32.xlu0 %v2875_v55, %s2581_s12  ;;  %898 = vrot.lane.b32.xlu2 %v2875_v55, %s2582_s3  ;;  %s2594_s12 = smov 24  }
 0x200   : > { %819 = vrot.lane.b32.xlu1 %v2875_v55, %s2583_s10 }
 0x207   : > { %1060 = vrot.lane.b32.xlu0 %v2875_v55, %s3146_s16  ;;  %s3188_s16 = sshll.u32 %s2817_s8, 3 }
 0x208   : > { %900 = vrot.lane.b32.xlu1 %v2875_v55, %s2585_s22 }
 0x259   : > { %v899_v59 = vpop.permute.xlu2 %898 }
 0x271   : > { %v873_v56 = vpop.permute.xlu0 %872 }
 0x272   : > { %v820_v57 = vpop.permute.xlu1 %819  ;;  %893 = vmatpush.msra.mxu2 %v873_v56 }
 0x273   : > { %2009 = vmatpush.xpose.msk.msra.mxu1 %vm821_vm9, %v820_v57 }
 0x276   : > { %2010 = vmatmul.msk.f32.vlgmr.msra.gmra.mxu1 %vm821_vm9, %v2875_v55 }
 0x279   : > { %v1061_v12 = vpop.permute.xlu0 %1060 }
 0x27a   : > { %v901_v58 = vpop.permute.xlu1 %900 }
 0x27b   : > { %2012 = vmatpush.xpose.msk.msra.mxu3 %vm821_vm9, %v901_v58 }
 0x27e   : > { %2013 = vmatmul.msk.f32.vlgmr.msra.gmra.mxu3 %vm821_vm9, %v899_v59 }
 0x2f3   : > { %v843_v62 = vpop.f32.mrf.mxu1 }
 0x2f4   : > { %v846_v1 = vmul.f32 0.35355338, %v843_v62 }
 0x2f6   : > { %v847_v2 = vsel %vm2891_vm10, %v846_v1, -1e+09 }
 0x2f7   : > { %v848_v3 = vsel %vm821_vm9, %v847_v2, -inf }
 0x2f8   : > { %849 = vmax.xlane.f32.xlu2 %v848_v3 }
 0x301   : > { %v923_v4 = vpop.f32.mrf.mxu3 }
 0x302   : > { %v926_v5 = vmul.f32 0.35355338, %v923_v4 }
 0x304   : > { %v927_v6 = vsel %vm2891_vm10, %v926_v5, -1e+09 }
 0x305   : > { %v928_v7 = vsel %vm821_vm9, %v927_v6, -inf }
 0x306   : > { %929 = vmax.xlane.f32.xlu0 %v928_v7 }
 0x310   : > { %952 = vrot.lane.b32.xlu2 %v2875_v55, %s2586_s0 }
 0x31a   : > { %980 = vrot.lane.b32.xlu0 %v2875_v55, %s3144_s18  ;;  %s715_s18 = scalar_select %p714_p1, %s2714_s21, 1 }
 0x36b   : > { %v850_v9 = vpop.xlane.xlu2 %849 }
 0x36c   : > { %v851_v10 = vsub.f32 %v847_v2, %v850_v9 }
 0x36e   : > { %v852_v11 = vmul.f32 1.442695, %v851_v10 }
 0x370   : > { %2232 = vpow2.f32 %v852_v11 }
 0x373   : > { %v953_v13 = vpop.permute.xlu2 %952 }
 0x374   : > { %973 = vmatpush.msrb.mxu2 %v953_v13 }
 0x376   : > { %v2233_v14 = vpop.eup %2232 }
 0x377   : > { %v854_v15 = vsel %vm821_vm9, %v2233_v14, 0.0 }
 0x378   : > { %855 = vadd.xlane.f32.xlu1 %v854_v15 }
 0x379   : > { %v930_v16 = vpop.xlane.xlu0 %929 }
 0x37a   : > { %v931_v17 = vsub.f32 %v927_v6, %v930_v16 }
 0x37c   : > { %v932_v18 = vmul.f32 1.442695, %v931_v17 }
 0x37e   : > { %2234 = vpow2.f32 %v932_v18 }
 0x384   : > { %v2235_v19 = vpop.eup %2234 }
 0x385   : > { %v934_v20 = vsel %vm821_vm9, %v2235_v19, 0.0 }
 0x386   : > { %935 = vadd.xlane.f32.xlu0 %v934_v20 }
 0x38c   : > { %v981_v21 = vpop.permute.xlu0 %980 }
 0x38d   : > { %2015 = vmatpush.xpose.msk.msrb.mxu1 %vm821_vm9, %v981_v21 }
 0x391   : > { %1058 = vrot.lane.b32.xlu1 %v2875_v55, %s2588_s1 }
 0x39a   : > { %978 = vrot.lane.b32.xlu0 %v2875_v55, %s2589_s19 }
 0x3eb   : > { %v856_v22 = vpop.xlane.xlu1 %855 }
 0x3ec   : > { %2236 = vrcp.f32 %v856_v22  ;;  %v868_v27 = vand.u32 2147483648, %v856_v22  ;;  %v866_v29 = vand.u32 2147483647, %v856_v22  ;;  %vm862_vm12 = vweird.f32 %v856_v22 }
 0x3ee   : > { %v869_v32 = vor.u32 1.1754944e-38, %v868_v27  ;;  %vm867_vm14 = vcmp.eq.f32.partialorder %v866_v29, 8.507059e+37 }
 0x3f2   : > { %v2237_v23 = vpop.eup %2236 }
 0x3f3   : > { %v858_v25 = vmul.f32 %v2237_v23, %v856_v22  ;;  %vm863_vm11 = vweird.f32 %v2237_v23 }
 0x3f4   : > { %vm864_vm13 = vmor %vm862_vm12, %vm863_vm11 }
 0x3f5   : > { %v859_v26 = vsub.f32 1.0, %v858_v25 }
 0x3f7   : > { %v860_v28 = vmul.f32 %v2237_v23, %v859_v26 }
 0x3f9   : > { %v936_v30 = vpop.xlane.xlu0 %935  ;;  %v861_v31 = vadd.f32 %v2237_v23, %v860_v28 }
 0x3fa   : > { %2238 = vrcp.f32 %v936_v30  ;;  %v948_v39 = vand.u32 2147483648, %v936_v30  ;;  %v946_v41 = vand.u32 2147483647, %v936_v30  ;;  %vm942_vm1 = vweird.f32 %v936_v30 }
 0x3fb   : > { %v865_v33 = vsel %vm864_vm13, %v2237_v23, %v861_v31  ;;  %vm1151_vm13 = vcmask 130048  }
 0x3fc   : > { %v870_v34 = vsel %vm867_vm14, %v869_v32, %v865_v33  ;;  %v949_v43 = vor.u32 1.1754944e-38, %v948_v39  ;;  %vm947_vm3 = vcmp.eq.f32.partialorder %v946_v41, 8.507059e+37  ;;  %v1155_v39 = vld [vmem:[%s3127_s6] sm:$0xff]  ;;  %vm1153_vm14 = vcmask 195584  }
 0x3fd   : > { %v871_v35 = vmul.f32 %v2233_v14, %v870_v34 }
 0x3ff   : > { %2011 = vmatmul.msk.f32.vlgmr.msra.gmra.mxu2 %vm821_vm9, %v871_v35 }
 0x400   : > { %v2239_v36 = vpop.eup %2238  ;;  %2018 = vmatpush.xpose.msk.msra.mxu2 %vm821_vm9, %v1061_v12 }
 0x401   : > { %v938_v37 = vmul.f32 %v2239_v36, %v936_v30  ;;  %vm943_vm15 = vweird.f32 %v2239_v36 }
 0x402   : > { %vm944_vm2 = vmor %vm942_vm1, %vm943_vm15 }
 0x403   : > { %v939_v38 = vsub.f32 1.0, %v938_v37  ;;  %v1059_v48 = vpop.permute.xlu1 %1058  ;;  %v1157_v37 = vld [vmem:[%s3127_s6 + $0x10] sm:$0xff] }
 0x405   : > { %v940_v40 = vmul.f32 %v2239_v36, %v939_v38  ;;  %v1156_v38 = vld [vmem:[%s3127_s6 + $0x8] sm:$0xff] }
 0x407   : > { %v941_v42 = vadd.f32 %v2239_v36, %v940_v40 }
 0x409   : > { %v945_v44 = vsel %vm944_vm2, %v2239_v36, %v941_v42  ;;  %v1158_v36 = vld [vmem:[%s3127_s6 + $0x18] sm:$0xff] }
 0x40a   : > { %v950_v45 = vsel %vm947_vm3, %v949_v43, %v945_v44  ;;  %1178 = vmatpush.msra.mxu1 %v1158_v36 }
 0x40b   : > { %v951_v46 = vmul.f32 %v2235_v19, %v950_v45 }
 0x40c   : > { %v979_v47 = vpop.permute.xlu0 %978  ;;  %1179 = vmatpush.msra.mxu1 %v1157_v37 }
 0x40d   : > { %2014 = vmatmul.msk.f32.vlgmr.msrb.gmra.mxu2 %vm821_vm9, %v951_v46  ;;  %2016 = vmatmul.msk.f32.vlgmr.msrb.gmra.mxu1 %vm821_vm9, %v979_v47  ;;  %v1233_v46 = vld [vmem:[#allocation9 + $0x10] sm:$0xff]  ;;  %v1234_v47 = vld [vmem:[#allocation9 + $0x18] sm:$0xff] }
 0x40e   : > { %1180 = vmatpush.msra.mxu1 %v1156_v38 }
 0x410   : > { %1181 = vmatpush.msra.mxu1 %v1155_v39 }
 0x415   : > { %2019 = vmatmul.msk.f32.vlgmr.msra.gmra.mxu2 %vm821_vm9, %v1059_v48  ;;  %v2188_v48 = vpack.i.bf16 %v1233_v46, %v1234_v47 }
 0x482   : > { %v2916_v49 = vpop.f32.mrf.mxu2 }
 0x48a   : > { %v1003_v50 = vpop.f32.mrf.mxu1 }
 0x48b   : > { %v1006_v51 = vmul.f32 0.35355338, %v1003_v50  ;;  %v2219_v50 = vld [vmem:[%s3128_s7] ss:$0 sm:$0xff] }
 0x48d   : > { %v1007_v52 = vsel %vm2891_vm10, %v1006_v51, -1e+09 }
 0x48e   : > { %v1008_v53 = vsel %vm821_vm9, %v1007_v52, -inf }
 0x48f   : > { %1009 = vmax.xlane.f32.xlu2 %v1008_v53 }
 0x490   : > { %v975_v54 = vpop.f32.mrf.mxu2 }
 0x498   : > { %v1083_v56 = vpop.f32.mrf.mxu2 }
 0x499   : > { %v1086_v57 = vmul.f32 0.35355338, %v1083_v56  ;;  %v1232_v56 = vld [vmem:[#allocation9 + $0x8] sm:$0xff] }
 0x49b   : > { %v1087_v58 = vsel %vm2891_vm10, %v1086_v57, -1e+09 }
 0x49c   : > { %v1088_v59 = vsel %vm821_vm9, %v1087_v58, -inf }
 0x49d   : > { %1089 = vmax.xlane.f32.xlu0 %v1088_v59 }
 0x4b1   : > { %1032 = vrot.lane.b32.xlu0 %v2875_v55, %s2590_s15  ;;  %s3176_s15 = sld [smem:[#allocation26_spill]] }
 0x502   : > { %v1010_v60 = vpop.xlane.xlu2 %1009 }
 0x503   : > { %v1011_v61 = vsub.f32 %v1007_v52, %v1010_v60 }
 0x505   : > { %v1012_v62 = vmul.f32 1.442695, %v1011_v61 }
 0x507   : > { %2240 = vpow2.f32 %v1012_v62 }
 0x50d   : > { %v2241_v1 = vpop.eup %2240 }
 0x50e   : > { %v1014_v2 = vsel %vm821_vm9, %v2241_v1, 0.0 }
 0x50f   : > { %1015 = vadd.xlane.f32.xlu1 %v1014_v2 }
 0x510   : > { %v1090_v3 = vpop.xlane.xlu0 %1089 }
 0x511   : > { %v1091_v4 = vsub.f32 %v1087_v58, %v1090_v3 }
 0x513   : > { %v1092_v5 = vmul.f32 1.442695, %v1091_v4 }
 0x515   : > { %2242 = vpow2.f32 %v1092_v5 }
 0x51b   : > { %v2243_v63 = vpop.eup %2242 }
 0x51c   : > { %v1094_v6 = vsel %vm821_vm9, %v2243_v63, 0.0 }
 0x51d   : > { %1095 = vadd.xlane.f32.xlu2 %v1094_v6 }
 0x523   : > { %v1033_v7 = vpop.permute.xlu0 %1032 }
 0x524   : > { %1053 = vmatpush.msrb.mxu3 %v1033_v7  ;;  %v2220_v7 = vld [vmem:[%s3130_s9] ss:$0 sm:$0xff] }
 0x526   : > { %1254 = vmatpush.msra.mxu3 %v1234_v47 }
 0x528   : > { %1139 = vrot.lane.b32.xlu1 %v975_v54, %s3145_s20  ;;  %1255 = vmatpush.msra.mxu3 %v1233_v46  ;;  %v1231_v54 = vld [vmem:[#allocation9] sm:$0xff]  ;;  %s2052_s20 = sshll.u32 %s715_s18, 4  ;;  %s2022_s18 = sld [smem:[#allocation14 + $0x1]] }
 0x529   : > { %v2193_v57 = vpack.i.bf16 %v1231_v54, %v1232_v56 }
 0x52a   : > { %1256 = vmatpush.msra.mxu3 %v1232_v56 }
 0x52c   : > { %1257 = vmatpush.msra.mxu3 %v1231_v54 }
 0x535   : > { %1112 = vrot.lane.b32.xlu2 %v2875_v55, %s2592_s26  ;;  %s718_s26 = scalar_lea.vmem %s3176_s15, %s2052_s20  ;;  %s2023_s20 = sld [smem:[#allocation15 + $0x1]] }
 0x536   : > { %v721_v6 = vld [vmem:[%s718_s26 + $0x8] sm:$0xff]  ;;  %s3187_s15 = sld [smem:[#allocation37_spill]] }
 0x582   : > { %v1016_v9 = vpop.xlane.xlu1 %1015 }
 0x583   : > { %2244 = vrcp.f32 %v1016_v9  ;;  %v1028_v13 = vand.u32 2147483648, %v1016_v9  ;;  %v1026_v15 = vand.u32 2147483647, %v1016_v9  ;;  %vm1022_vm5 = vweird.f32 %v1016_v9 }
 0x585   : > { %v1029_v18 = vor.u32 1.1754944e-38, %v1028_v13  ;;  %vm1027_vm7 = vcmp.eq.f32.partialorder %v1026_v15, 8.507059e+37 }
 0x589   : > { %v2245_v10 = vpop.eup %2244 }
 0x58a   : > { %v1018_v11 = vmul.f32 %v2245_v10, %v1016_v9  ;;  %vm1023_vm4 = vweird.f32 %v2245_v10 }
 0x58b   : > { %vm1024_vm6 = vmor %vm1022_vm5, %vm1023_vm4 }
 0x58c   : > { %v1019_v12 = vsub.f32 1.0, %v1018_v11 }
 0x58e   : > { %v1020_v14 = vmul.f32 %v2245_v10, %v1019_v12 }
 0x590   : > { %v1021_v16 = vadd.f32 %v2245_v10, %v1020_v14  ;;  %v1096_v17 = vpop.xlane.xlu2 %1095 }
 0x591   : > { %2246 = vrcp.f32 %v1096_v17  ;;  %v1108_v26 = vand.u32 2147483648, %v1096_v17  ;;  %v1106_v28 = vand.u32 2147483647, %v1096_v17  ;;  %vm1102_vm10 = vweird.f32 %v1096_v17 }
 0x592   : > { %v1025_v19 = vsel %vm1024_vm6, %v2245_v10, %v1021_v16 }
 0x593   : > { %v1030_v20 = vsel %vm1027_vm7, %v1029_v18, %v1025_v19  ;;  %v1109_v30 = vor.u32 1.1754944e-38, %v1108_v26  ;;  %vm1107_vm12 = vcmp.eq.f32.partialorder %v1106_v28, 8.507059e+37  ;;  %v1226_v28 = vstv %s2022_s18  ;;  %s713_s18 = scalar_lea.vmem [#allocation17], %s3188_s16 }
 0x594   : > { %v1031_v21 = vmul.f32 %v2241_v1, %v1030_v20 }
 0x596   : > { %2017 = vmatmul.msk.f32.vlgmr.msrb.gmra.mxu3 %vm821_vm9, %v1031_v21 }
 0x597   : > { %v2247_v55 = vpop.eup %2246 }
 0x598   : > { %v1098_v22 = vmul.f32 %v2247_v55, %v1096_v17  ;;  %v1113_v23 = vpop.permute.xlu2 %1112  ;;  %vm1103_vm8 = vweird.f32 %v2247_v55 }
 0x599   : > { %1133 = vmatpush.msrb.mxu2 %v1113_v23  ;;  %vm1104_vm11 = vmor %vm1102_vm10, %vm1103_vm8 }
 0x59a   : > { %v1099_v25 = vsub.f32 1.0, %v1098_v22  ;;  %v1140_v41 = vpop.permute.xlu1 %1139 }
 0x59b   : > { %v1150_v42 = vsel %vm821_vm9, %v2916_v49, %v1140_v41 }
 0x59c   : > { %v1100_v27 = vmul.f32 %v2247_v55, %v1099_v25 }
 0x59e   : > { %v1101_v29 = vadd.f32 %v2247_v55, %v1100_v27 }
 0x5a0   : > { %v1105_v31 = vsel %vm1104_vm11, %v2247_v55, %v1101_v29 }
 0x5a1   : > { %v1110_v32 = vsel %vm1107_vm12, %v1109_v30, %v1105_v31 }
 0x5a2   : > { %v1111_v33 = vmul.f32 %v2243_v63, %v1110_v32  ;;  %v720_v63 = vld [vmem:[%s718_s26] sm:$0xff]  ;;  %s3184_s26 = sld [smem:[#allocation34_spill]] }
 0x5a4   : > { %2020 = vmatmul.msk.f32.vlgmr.msrb.gmra.mxu2 %vm821_vm9, %v1111_v33 }
 0x619   : > { %v1055_v34 = vpop.f32.mrf.mxu3 }
 0x61a   : > { %1143 = vrot.lane.b32.xlu0 %v1055_v34, %s3147_s25  ;;  %v1229_v34 = vstv %s2023_s20  ;;  %s3183_s25 = sld [smem:[#allocation31_spill]]  ;;  %s1829_s20 = sshll.u32 %s713_s18, 4  ;;  %s1830_s20 = int_to_ptr.vmem [resolvable:$true] %s1829_s20 }
 0x627   : > { %v1135_v35 = vpop.f32.mrf.mxu2 }
 0x628   : > { %1147 = vrot.lane.b32.xlu0 %v1135_v35, %s2594_s12 }
 0x630   : > { %2189 = vrot.lane.b32.xlu0 %v2188_v48, %s2583_s10 }
 0x638   : > { %2194 = vrot.lane.b32.xlu0 %v2193_v57, %s2583_s10 }
 0x640   : > { %1278 = vrot.lane.b32.xlu0 %v2220_v7, %s2583_s10 }
 0x68c   : > { %v1144_v40 = vpop.permute.xlu0 %1143 }
 0x68d   : > { %v1152_v43 = vsel %vm1151_vm13, %v1150_v42, %v1144_v40 }
 0x69a   : > { %v1148_v44 = vpop.permute.xlu0 %1147 }
 0x69b   : > { %v1154_v45 = vsel %vm1153_vm14, %v1152_v43, %v1148_v44 }
 0x69c   : > { %2021 = vmatmul.msk.f32.vlgmr.msra.gmra.mxu1 %vm730_vm0, %v1154_v45 }
 0x6a2   : > { %v2190_v58 = vpop.permute.xlu0 %2189 }
 0x6a3   : > { %v2191_v59 = vunpack.i.l.bf16 %v2190_v58  ;;  %v2192_v2 = vunpack.i.h.bf16 %v2190_v58 }
 0x6a5   : > { %1299 = vmatpush.msrb.mxu0 %v2191_v59 }
 0x6a7   : > { %1300 = vmatpush.msrb.mxu0 %v2192_v2 }
 0x6aa   : > { %v2195_v3 = vpop.permute.xlu0 %2194 }
 0x6ab   : > { %v2196_v4 = vunpack.i.l.bf16 %v2195_v3  ;;  %v2197_v5 = vunpack.i.h.bf16 %v2195_v3 }
 0x6ad   : > { %1301 = vmatpush.msrb.mxu0 %v2196_v4 }
 0x6af   : > { %1302 = vmatpush.msrb.mxu0 %v2197_v5 }
 0x6b0   : > { %2025 = vmatmul.msk.f32.vlgmr.msrb.gmra.mxu0 %vm730_vm0, %v720_v63 }
 0x6b2   : > { %v1279_v38 = vpop.permute.xlu0 %1278 }
 0x6b8   : > { %2026 = vmatmul.msk.f32.gmra.mxu0 %vm730_vm0, %v721_v6 }
 0x719   : > { %v1183_v51 = vpop.f32.mrf.mxu1 }
 0x71a   : > { %v1184_v49 = vadd.f32 %v2219_v50, %v1183_v51 }
 0x71c   : > { %v2955_v52 = vadd.f32 %v1184_v49, %v2847_v0 }
 0x71e   : > { %v1189_v53 = vsel %vm730_vm0, %v2955_v52, 0.0 }
 0x71f   : > { %1190 = vadd.xlane.f32.xlu2 %v1189_v53  ;;  %v725_v53 = vld [vmem:[#allocation8] sm:$0x3] }
 0x720   : > { %v726_v54 = vunpack.c.0.s8 %v725_v53 }
 0x722   : > { %vm2994_vm6 = vcmp.ne.s32.totalorder %v726_v54, 0 }
 0x72d   : > { %v1304_v37 = vpop.f32.mrf.mxu0 }
 0x72e   : > { %v1305_v40 = vadd.f32 %v1304_v37, %v1279_v38 }
 0x735   : > { %v1307_v39 = vpop.f32.mrf.mxu0 }
 0x736   : > { %v1308_v41 = vadd.f32 %v1307_v39, %v1279_v38 }
 0x737   : > { %1396 = vrot.lane.b32.xlu2 %v1305_v40, %s2582_s3 }
 0x738   : > { %2027 = vmatpush.xpose.msk.msra.mxu2 %vm821_vm9, %v1308_v41  ;;  %v2979_v42 = vpack.i.bf16 %v1305_v40, %v1308_v41 }
 0x73c   : > { %2028 = vmatpush.xpose.msk.msra.mxu2 %vm821_vm9, %v1305_v40 }
 0x73f   : > { %2199 = vrot.lane.b32.xlu2 %v2979_v42, %s2583_s10  ;;  %s3180_s10 = smov 8  }
 0x747   : > { %1483 = vrot.lane.b32.xlu2 %v1305_v40, %s2589_s19 }
 0x792   : > { %v1191_v60 = vpop.xlane.xlu2 %1190 }
 0x793   : > { %v1192_v0 = vmul.f32 %v1191_v60, %v2851_v8 }
 0x795   : > { %v1193_v61 = vsub.f32 %v2955_v52, %v1192_v0 }
 0x797   : > { %v1194_v62 = vmul.f32 %v1193_v61, %v1193_v61  ;;  %v1227_v31 = vmul.f32 %v1226_v28, %v1193_v61 }
 0x799   : > { %v1195_v1 = vsel %vm730_vm0, %v1194_v62, 0.0 }
 0x79a   : > { %1196 = vadd.xlane.f32.xlu1 %v1195_v1  ;;  %v1397_v45 = vpop.permute.xlu2 %1396 }
 0x7a2   : > { %v2200_v46 = vpop.permute.xlu2 %2199 }
 0x7a3   : > { %v2202_v47 = vunpack.i.h.bf16 %v2200_v46  ;;  %v2201_v48 = vunpack.i.l.bf16 %v2200_v46 }
 0x7a5   : > { %1388 = vmatpush.msrb.mxu1 %v2201_v48 }
 0x7a7   : > { %1389 = vmatpush.msrb.mxu1 %v2202_v47 }
 0x7b3   : > { %1398 = vrot.lane.b32.xlu1 %v1308_v41, %s2582_s3 }
 0x80d   : > { %v1197_v9 = vpop.xlane.xlu1 %1196 }
 0x80e   : > { %v1198_v10 = vmul.f32 %v1197_v9, %v2868_v24  ;;  %v1484_v9 = vpop.permute.xlu2 %1483 }
 0x810   : > { %2248 = vrsqrt.f32 %v1198_v10  ;;  %vm1206_vm15 = vcmp.eq.f32.partialorder %v1198_v10, inf  ;;  %v1209_v18 = vand.u32 2147483648, %v1198_v10  ;;  %vm1208_vm1 = vcmp.eq.f32.partialorder %v1198_v10, 0.0 }
 0x816   : > { %v2249_v11 = vpop.eup %2248 }
 0x817   : > { %v1200_v12 = vmul.f32 %v2249_v11, %v1198_v10 }
 0x819   : > { %v1201_v13 = vmul.f32 %v2249_v11, %v1200_v12 }
 0x81b   : > { %v1202_v14 = vmul.f32 0.5, %v1201_v13 }
 0x81d   : > { %v1203_v15 = vsub.f32 1.5, %v1202_v14 }
 0x81f   : > { %v1204_v16 = vmul.f32 %v2249_v11, %v1203_v15 }
 0x821   : > { %v1205_v17 = vmul.f32 %v1204_v16, %v1198_v10 }
 0x823   : > { %v1207_v19 = vsel %vm1206_vm15, %v1198_v10, %v1205_v17 }
 0x824   : > { %v1210_v20 = vsel %vm1208_vm1, %v1209_v18, %v1207_v19 }
 0x825   : > { %v1211_v21 = vadd.f32 1e-06, %v1210_v20  ;;  %v1399_v50 = vpop.permute.xlu1 %1398 }
 0x826   : > { %2031 = vmatpush.xpose.msk.msrb.mxu3 %vm821_vm9, %v1399_v50 }
 0x827   : > { %2250 = vrcp.f32 %v1211_v21  ;;  %v1223_v25 = vand.u32 2147483648, %v1211_v21  ;;  %v1221_v27 = vand.u32 2147483647, %v1211_v21  ;;  %vm1217_vm3 = vweird.f32 %v1211_v21 }
 0x829   : > { %v1224_v30 = vor.u32 1.1754944e-38, %v1223_v25  ;;  %vm1222_vm5 = vcmp.eq.f32.partialorder %v1221_v27, 8.507059e+37 }
 0x82a   : > { %2032 = vmatpush.xpose.msk.msrb.mxu3 %vm821_vm9, %v1397_v45 }
 0x82d   : > { %v2251_v55 = vpop.eup %2250 }
 0x82e   : > { %v1213_v22 = vmul.f32 %v2251_v55, %v1211_v21  ;;  %vm1218_vm2 = vweird.f32 %v2251_v55 }
 0x82f   : > { %vm1219_vm4 = vmor %vm1217_vm3, %vm1218_vm2 }
 0x830   : > { %v1214_v23 = vsub.f32 1.0, %v1213_v22 }
 0x832   : > { %v1215_v26 = vmul.f32 %v2251_v55, %v1214_v23 }
 0x834   : > { %v1216_v29 = vadd.f32 %v2251_v55, %v1215_v26 }
 0x836   : > { %v1220_v32 = vsel %vm1219_vm4, %v2251_v55, %v1216_v29 }
 0x837   : > { %v1225_v33 = vsel %vm1222_vm5, %v1224_v30, %v1220_v32 }
 0x838   : > { %v1228_v35 = vmul.f32 %v1227_v31, %v1225_v33 }
 0x83a   : > { %v1230_v36 = vadd.f32 %v1229_v34, %v1228_v35 }
 0x83c   : > { %2024 = vmatmul.msk.f32.vlgmr.msra.gmra.mxu3 %vm730_vm0, %v1230_v36 }
 0x8bf   : > { %v1259_v43 = vpop.f32.mrf.mxu3 }
 0x8c0   : > { %v1260_v44 = vadd.f32 %v2220_v7, %v1259_v43 }
 0x8c2   : > { %1394 = vrot.lane.b32.xlu1 %v1260_v44, %s2582_s3  ;;  %2029 = vmatmul.msk.f32.vlgmr.msra.gmra.mxu2 %vm821_vm9, %v1260_v44  ;;  %s3179_s3 = smov 72  }
 0x8ca   : > { %1572 = vrot.lane.b32.xlu1 %v1308_v41, %s2588_s1 }
 0x8d2   : > { %1570 = vrot.lane.b32.xlu1 %v1305_v40, %s2588_s1 }
 0x934   : > { %v1395_v51 = vpop.permute.xlu1 %1394 }
 0x935   : > { %2033 = vmatmul.msk.f32.vlgmr.msrb.gmra.mxu3 %vm821_vm9, %v1395_v51 }
 0x93c   : > { %v1573_v49 = vpop.permute.xlu1 %1572 }
 0x93d   : > { %2039 = vmatpush.xpose.msk.msra.mxu0 %vm821_vm9, %v1573_v49 }
 0x944   : > { %v1571_v56 = vpop.permute.xlu1 %1570 }
 0x945   : > { %v1336_v57 = vpop.f32.mrf.mxu2  ;;  %2040 = vmatpush.xpose.msk.msra.mxu0 %vm821_vm9, %v1571_v56 }
 0x946   : > { %v1339_v59 = vmul.f32 0.35355338, %v1336_v57 }
 0x948   : > { %v1340_v60 = vsel %vm2994_vm6, %v1339_v59, -1e+09 }
 0x949   : > { %v1341_v0 = vsel %vm1151_vm13, %v1340_v60, -inf }
 0x94a   : > { %1342 = vmax.xlane.f32.xlu0 %v1341_v0 }
 0x95e   : > { %1485 = vrot.lane.b32.xlu0 %v1308_v41, %s2589_s19 }
 0x966   : > { %1568 = vrot.lane.b32.xlu0 %v1260_v44, %s2588_s1  ;;  %s3182_s1 = smov 16  }
 0x9b8   : > { %v1423_v61 = vpop.f32.mrf.mxu3 }
 0x9b9   : > { %v1426_v62 = vmul.f32 0.35355338, %v1423_v61 }
 0x9bb   : > { %v1427_v1 = vsel %vm2994_vm6, %v1426_v62, -1e+09 }
 0x9bc   : > { %v1428_v2 = vsel %vm1151_vm13, %v1427_v1, -inf }
 0x9bd   : > { %1429 = vmax.xlane.f32.xlu1 %v1428_v2  ;;  %v1343_v3 = vpop.xlane.xlu0 %1342 }
 0x9be   : > { %v1344_v4 = vsub.f32 %v1340_v60, %v1343_v3 }
 0x9c0   : > { %v1345_v5 = vmul.f32 1.442695, %v1344_v4 }
 0x9c2   : > { %2252 = vpow2.f32 %v1345_v5 }
 0x9c8   : > { %v2253_v63 = vpop.eup %2252 }
 0x9c9   : > { %v1347_v6 = vsel %vm1151_vm13, %v2253_v63, 0.0 }
 0x9ca   : > { %1348 = vadd.xlane.f32.xlu2 %v1347_v6 }
 0x9d0   : > { %v1486_v7 = vpop.permute.xlu0 %1485 }
 0x9d1   : > { %2035 = vmatpush.xpose.msk.msra.mxu1 %vm821_vm9, %v1486_v7 }
 0x9d5   : > { %2036 = vmatpush.xpose.msk.msra.mxu1 %vm821_vm9, %v1484_v9 }
 0x9d8   : > { %v1569_v10 = vpop.permute.xlu0 %1568 }
 0x9d9   : > { %2041 = vmatmul.msk.f32.vlgmr.msra.gmra.mxu0 %vm821_vm9, %v1569_v10 }
 0x9e2   : > { %1481 = vrot.lane.b32.xlu2 %v1260_v44, %s2589_s19  ;;  %s2044_s19 = sld [smem:[#allocation14 + $0x2]] }
 0xa30   : > { %v1430_v11 = vpop.xlane.xlu1 %1429 }
 0xa31   : > { %v1431_v12 = vsub.f32 %v1427_v1, %v1430_v11 }
 0xa33   : > { %v1432_v13 = vmul.f32 1.442695, %v1431_v12 }
 0xa35   : > { %2254 = vpow2.f32 %v1432_v13 }
 0xa3b   : > { %v2255_v14 = vpop.eup %2254 }
 0xa3c   : > { %v1434_v15 = vsel %vm1151_vm13, %v2255_v14, 0.0 }
 0xa3d   : > { %1435 = vadd.xlane.f32.xlu1 %v1434_v15  ;;  %v1349_v16 = vpop.xlane.xlu2 %1348 }
 0xa3e   : > { %2256 = vrcp.f32 %v1349_v16  ;;  %v1361_v20 = vand.u32 2147483648, %v1349_v16  ;;  %v1359_v55 = vand.u32 2147483647, %v1349_v16  ;;  %vm1355_vm8 = vweird.f32 %v1349_v16 }
 0xa40   : > { %v1362_v23 = vor.u32 1.1754944e-38, %v1361_v20  ;;  %vm1360_vm11 = vcmp.eq.f32.partialorder %v1359_v55, 8.507059e+37 }
 0xa44   : > { %v2257_v17 = vpop.eup %2256 }
 0xa45   : > { %v1351_v18 = vmul.f32 %v2257_v17, %v1349_v16  ;;  %vm1356_vm7 = vweird.f32 %v2257_v17  ;;  %v1482_v30 = vpop.permute.xlu2 %1481 }
 0xa46   : > { %vm1357_vm10 = vmor %vm1355_vm8, %vm1356_vm7 }
 0xa47   : > { %v1352_v19 = vsub.f32 1.0, %v1351_v18 }
 0xa49   : > { %v1353_v21 = vmul.f32 %v2257_v17, %v1352_v19 }
 0xa4b   : > { %v1354_v22 = vadd.f32 %v2257_v17, %v1353_v21 }
 0xa4d   : > { %v1358_v25 = vsel %vm1357_vm10, %v2257_v17, %v1354_v22 }
 0xa4e   : > { %v1363_v26 = vsel %vm1360_vm11, %v1362_v23, %v1358_v25 }
 0xa4f   : > { %v1364_v27 = vmul.f32 %v2253_v63, %v1363_v26 }
 0xa51   : > { %2030 = vmatmul.msk.f32.vlgmr.msrb.gmra.mxu1 %vm1151_vm13, %v1364_v27 }
 0xa56   : > { %2204 = vrot.lane.b32.xlu1 %v2979_v42, %s2585_s22  ;;  %v1597_v28 = vpop.f32.mrf.mxu0  ;;  %s3181_s22 = smov 80  }
 0xa57   : > { %v1600_v29 = vmul.f32 0.35355338, %v1597_v28 }
 0xa59   : > { %2037 = vmatmul.msk.f32.vlgmr.msra.gmra.mxu1 %vm821_vm9, %v1482_v30  ;;  %v1601_v31 = vsel %vm2994_vm6, %v1600_v29, -1e+09 }
 0xa5a   : > { %v1602_v32 = vsel %vm1151_vm13, %v1601_v31, -inf }
 0xa5b   : > { %1603 = vmax.xlane.f32.xlu0 %v1602_v32 }
 0xab0   : > { %v1436_v33 = vpop.xlane.xlu1 %1435 }
 0xab1   : > { %2258 = vrcp.f32 %v1436_v33  ;;  %v1448_v39 = vand.u32 2147483648, %v1436_v33  ;;  %vm1442_vm15 = vweird.f32 %v1436_v33  ;;  %v1446_v40 = vand.u32 2147483647, %v1436_v33 }
 0xab3   : > { %v1449_v43 = vor.u32 1.1754944e-38, %v1448_v39  ;;  %vm1447_vm2 = vcmp.eq.f32.partialorder %v1446_v40, 8.507059e+37 }
 0xab7   : > { %v2259_v34 = vpop.eup %2258 }
 0xab8   : > { %v1438_v35 = vmul.f32 %v2259_v34, %v1436_v33  ;;  %vm1443_vm12 = vweird.f32 %v2259_v34 }
 0xab9   : > { %vm1444_vm1 = vmor %vm1442_vm15, %vm1443_vm12 }
 0xaba   : > { %v1439_v36 = vsub.f32 1.0, %v1438_v35  ;;  %v1672_v35 = vld [vmem:[#allocation11 + $0x10] sm:$0xff] }
 0xabc   : > { %v1440_v37 = vmul.f32 %v2259_v34, %v1439_v36  ;;  %v1671_v36 = vld [vmem:[#allocation11 + $0x8] sm:$0xff] }
 0xabe   : > { %v1441_v38 = vadd.f32 %v2259_v34, %v1440_v37 }
 0xac0   : > { %v1445_v41 = vsel %vm1444_vm1, %v2259_v34, %v1441_v38  ;;  %v1673_v34 = vld [vmem:[#allocation11 + $0x18] sm:$0xff]  ;;  %v1670_v38 = vld [vmem:[#allocation11] sm:$0xff] }
 0xac1   : > { %v1450_v45 = vsel %vm1447_vm2, %v1449_v43, %v1445_v41  ;;  %1693 = vmatpush.msrb.mxu1 %v1673_v34  ;;  %vm1790_vm2 = vcmask 523264  }
 0xac2   : > { %v1451_v48 = vmul.f32 %v2255_v14, %v1450_v45 }
 0xac3   : > { %1694 = vmatpush.msrb.mxu1 %v1672_v35 }
 0xac5   : > { %1695 = vmatpush.msrb.mxu1 %v1671_v36 }
 0xac7   : > { %1696 = vmatpush.msrb.mxu1 %v1670_v38 }
 0xac8   : > { %v2205_v44 = vpop.permute.xlu1 %2204 }
 0xac9   : > { %v2206_v46 = vunpack.i.l.bf16 %v2205_v44  ;;  %v2207_v47 = vunpack.i.h.bf16 %v2205_v44 }
 0xacb   : > { %1475 = vmatpush.msrb.mxu2 %v2206_v46  ;;  %v2221_v46 = vld [vmem:[%s3183_s25] ss:$0 sm:$0xff] }
 0xacd   : > { %1476 = vmatpush.msrb.mxu2 %v2207_v47 }
 0xace   : > { %v3019_v50 = vpop.f32.mrf.mxu1  ;;  %2034 = vmatmul.msk.f32.vlgmr.msrb.gmra.mxu2 %vm1151_vm13, %v1451_v48  ;;  %v1604_v51 = vpop.xlane.xlu0 %1603 }
 0xacf   : > { %v1605_v49 = vsub.f32 %v1601_v31, %v1604_v51 }
 0xad1   : > { %v1606_v53 = vmul.f32 1.442695, %v1605_v49 }
 0xad3   : > { %2260 = vpow2.f32 %v1606_v53 }
 0xad6   : > { %v1510_v54 = vpop.f32.mrf.mxu1 }
 0xad7   : > { %v1513_v56 = vmul.f32 0.35355338, %v1510_v54 }
 0xad9   : > { %v2261_v57 = vpop.eup %2260  ;;  %v1514_v59 = vsel %vm2994_vm6, %v1513_v56, -1e+09 }
 0xada   : > { %v1515_v60 = vsel %vm1151_vm13, %v1514_v59, -inf  ;;  %v1608_v0 = vsel %vm1151_vm13, %v2261_v57, 0.0 }
 0xadb   : > { %1516 = vmax.xlane.f32.xlu2 %v1515_v60  ;;  %1609 = vadd.xlane.f32.xlu0 %v1608_v0  ;;  %v1748_v60 = vld [vmem:[#allocation12 + $0x10] sm:$0xff]  ;;  %v1747_v0 = vld [vmem:[#allocation12 + $0x8] sm:$0xff] }
 0xaef   : > { %2214 = vrot.lane.b32.xlu0 %v2979_v42, %s3179_s3 }
 0xb4e   : > { %v1517_v61 = vpop.xlane.xlu2 %1516  ;;  %v1610_v62 = vpop.xlane.xlu0 %1609 }
 0xb4f   : > { %v1518_v1 = vsub.f32 %v1514_v59, %v1517_v61  ;;  %2262 = vrcp.f32 %v1610_v62  ;;  %v1622_v10 = vand.u32 2147483648, %v1610_v62  ;;  %vm1616_vm4 = vweird.f32 %v1610_v62  ;;  %v1749_v59 = vld [vmem:[#allocation12 + $0x18] sm:$0xff] }
 0xb50   : > { %v1620_v11 = vand.u32 2147483647, %v1610_v62 }
 0xb51   : > { %v1519_v2 = vmul.f32 1.442695, %v1518_v1  ;;  %v1478_v3 = vpop.f32.mrf.mxu2  ;;  %v1623_v13 = vor.u32 1.1754944e-38, %v1622_v10  ;;  %v1781_v10 = vld [vmem:[%s3184_s26 + $0x18] sm:$0xff] }
 0xb52   : > { %1656 = vrot.lane.b32.xlu1 %v1478_v3, %s3180_s10  ;;  %vm1621_vm6 = vcmp.eq.f32.partialorder %v1620_v11, 8.507059e+37  ;;  %s3185_s10 = sld [smem:[#allocation33_spill]] }
 0xb53   : > { %2264 = vpow2.f32 %v1519_v2 }
 0xb55   : > { %v2263_v58 = vpop.eup %2262 }
 0xb56   : > { %v1612_v4 = vmul.f32 %v2263_v58, %v1610_v62  ;;  %vm1617_vm3 = vweird.f32 %v2263_v58 }
 0xb57   : > { %vm1618_vm5 = vmor %vm1616_vm4, %vm1617_vm3 }
 0xb58   : > { %v1613_v5 = vsub.f32 1.0, %v1612_v4  ;;  %v1784_v4 = vld [vmem:[%s3184_s26 + $0x30] sm:$0xff] }
 0xb59   : > { %v2265_v63 = vpop.eup %2264 }
 0xb5a   : > { %v1614_v6 = vmul.f32 %v2263_v58, %v1613_v5  ;;  %v1521_v7 = vsel %vm1151_vm13, %v2265_v63, 0.0 }
 0xb5b   : > { %1522 = vadd.xlane.f32.xlu2 %v1521_v7 }
 0xb5c   : > { %v1615_v9 = vadd.f32 %v2263_v58, %v1614_v6  ;;  %v1782_v6 = vld [vmem:[%s3184_s26 + $0x20] sm:$0xff] }
 0xb5e   : > { %v1619_v12 = vsel %vm1618_vm5, %v2263_v58, %v1615_v9  ;;  %v1785_v58 = vld [vmem:[%s3184_s26 + $0x38] sm:$0xff] }
 0xb5f   : > { %v1624_v15 = vsel %vm1621_vm6, %v1623_v13, %v1619_v12  ;;  %1802 = vmatpush.msrb.mxu0 %v1785_v58 }
 0xb60   : > { %v1625_v18 = vmul.f32 %v2261_v57, %v1624_v15 }
 0xb61   : > { %v2215_v14 = vpop.permute.xlu0 %2214  ;;  %1803 = vmatpush.msrb.mxu0 %v1784_v4 }
 0xb62   : > { %v2216_v16 = vunpack.i.l.bf16 %v2215_v14  ;;  %v2217_v17 = vunpack.i.h.bf16 %v2215_v14 }
 0xb64   : > { %1649 = vmatpush.msra.mxu2 %v2216_v16 }
 0xb66   : > { %1650 = vmatpush.msra.mxu2 %v2217_v17 }
 0xb67   : > { %2042 = vmatmul.msk.f32.vlgmr.msra.gmra.mxu2 %vm1151_vm13, %v1625_v18 }
 0xb73   : > { %2209 = vrot.lane.b32.xlu2 %v2979_v42, %s3181_s22  ;;  %s2049_s22 = sshll.u32 %s2714_s21, 3  ;;  %s1817_s21 = scalar_lea.sflag [#allocation4], %s2817_s8 }
 0xb74   : > { %s1827_s2 = scalar_lea.hbm %s3187_s15, %s2049_s22 }
 0xb75   : > { %s1831_s3 = sshll.u32 %s1827_s2, 4  ;;  %s1832_s3 = int_to_ptr.hbm [resolvable:$true] %s1831_s3 }
 0xbc4   : > { %v1657_v39 = vpop.permute.xlu1 %1656 }
 0xbc5   : > { %v1667_v40 = vsel %vm821_vm9, %v3019_v50, %v1657_v39 }
 0xbce   : > { %v1523_v19 = vpop.xlane.xlu2 %1522 }
 0xbcf   : > { %2266 = vrcp.f32 %v1523_v19  ;;  %v1535_v25 = vand.u32 2147483648, %v1523_v19  ;;  %v1533_v28 = vand.u32 2147483647, %v1523_v19  ;;  %vm1529_vm8 = vweird.f32 %v1523_v19 }
 0xbd1   : > { %v1536_v30 = vor.u32 1.1754944e-38, %v1535_v25  ;;  %vm1534_vm11 = vcmp.eq.f32.partialorder %v1533_v28, 8.507059e+37 }
 0xbd5   : > { %v2267_v20 = vpop.eup %2266 }
 0xbd6   : > { %v1525_v21 = vmul.f32 %v2267_v20, %v1523_v19  ;;  %v2210_v55 = vpop.permute.xlu2 %2209  ;;  %vm1530_vm7 = vweird.f32 %v2267_v20 }
 0xbd7   : > { %v2211_v22 = vunpack.i.l.bf16 %v2210_v55  ;;  %v2212_v26 = vunpack.i.h.bf16 %v2210_v55  ;;  %vm1531_vm10 = vmor %vm1529_vm8, %vm1530_vm7 }
 0xbd8   : > { %v1526_v23 = vsub.f32 1.0, %v1525_v21 }
 0xbd9   : > { %1562 = vmatpush.msra.mxu3 %v2211_v22 }
 0xbda   : > { %v1527_v27 = vmul.f32 %v2267_v20, %v1526_v23 }
 0xbdb   : > { %1563 = vmatpush.msra.mxu3 %v2212_v26 }
 0xbdc   : > { %v1528_v29 = vadd.f32 %v2267_v20, %v1527_v27 }
 0xbdd   : > { %1769 = vmatpush.msrb.mxu3 %v1749_v59 }
 0xbde   : > { %v1532_v31 = vsel %vm1531_vm10, %v2267_v20, %v1528_v29  ;;  %v1741_v20 = vstv %s2044_s19  ;;  %v1780_v29 = vld [vmem:[%s3184_s26 + $0x10] sm:$0xff] }
 0xbdf   : > { %v1537_v42 = vsel %vm1534_vm11, %v1536_v30, %v1532_v31  ;;  %1770 = vmatpush.msrb.mxu3 %v1748_v60  ;;  %v1779_v30 = vld [vmem:[%s3184_s26 + $0x8] sm:$0xff]  ;;  %v1778_v31 = vld [vmem:[%s3184_s26] sm:$0xff] }
 0xbe0   : > { %v1538_v32 = vmul.f32 %v2265_v63, %v1537_v42  ;;  %v2222_v42 = vld [vmem:[%s3185_s10] ss:$0 sm:$0xff]  ;;  %s2496_s10 = sshra.s32 %s1832_s3, 4  ;;  %s2497_s10 = int_to_ptr.hbm [resolvable:$true] %s2496_s10 }
 0xbe1   : > { %1771 = vmatpush.msrb.mxu3 %v1747_v0  ;;  %p2503_p8 = scmp.lt.s32.totalorder %s2497_s10, %s3187_s15 }
 0xbe2   : > { %2038 = vmatmul.msk.f32.vlgmr.msra.gmra.mxu3 %vm1151_vm13, %v1538_v32 }
 0xbea   : > { %v1652_v33 = vpop.f32.mrf.mxu2 }
 0xbeb   : > { %1664 = vrot.lane.b32.xlu0 %v1652_v33, %s2594_s12  ;;  %s2045_s12 = sld [smem:[#allocation15 + $0x2]] }
 0xbf1   : > { %v1744_v26 = vstv %s2045_s12  ;;  %s3186_s12 = sld [smem:[#allocation35_spill]] }
 0xbf7   : > { %v2223_v35 = vld [vmem:[%s3186_s12] ss:$0 sm:$0xff]  ;;  %s2502_s12 = scalar_lea.hbm %s3187_s15, 16 }
 0xc5d   : > { %v1665_v43 = vpop.permute.xlu0 %1664 }
 0xc65   : > { %v1565_v37 = vpop.f32.mrf.mxu3 }
 0xc66   : > { %1660 = vrot.lane.b32.xlu2 %v1565_v37, %s3182_s1  ;;  %s2498_s1 = scalar_lea.hbm %s2497_s10, 8 }
 0xc67   : > { %p2499_p3 = scmp.ne.s32.totalorder %s2497_s10, %s2498_s1  ;;  %p2504_p7 = scmp.lt.s32.totalorder %s2502_s12, %s2498_s1 }
 0xc69   : > { %p2500_p4 = pnand %p2499_p3, %p2786_p13  ;;  %p2505_p9 = por %p2504_p7, %p2503_p8 }
 0xc6b   : > { %p2501_p12 = pneg %p2500_p4 }
 0xc6d   : > { %p2506_p10 = pnand %p2505_p9, %p2501_p12 }
 0xcc0   : > { %v1661_v41 = vpop.permute.xlu2 %1660 }
 0xcc1   : > { %v1668_v44 = vsel %vm1151_vm13, %v1667_v40, %v1661_v41 }
 0xcc2   : > { %v1669_v45 = vsel %vm1153_vm14, %v1668_v44, %v1665_v43 }
 0xcc3   : > { %2043 = vmatmul.msk.f32.vlgmr.msrb.gmra.mxu1 %vm730_vm0, %v1669_v45 }
 0xd40   : > { %v1698_v47 = vpop.f32.mrf.mxu1 }
 0xd41   : > { %v1699_v48 = vadd.f32 %v2221_v46, %v1698_v47 }
 0xd43   : > { %v3045_v51 = vadd.f32 %v1699_v48, %v2955_v52  ;;  %v1746_v52 = vld [vmem:[#allocation12] sm:$0xff] }
 0xd44   : > { %1772 = vmatpush.msrb.mxu3 %v1746_v52 }
 0xd45   : > { %v1704_v50 = vsel %vm730_vm0, %v3045_v51, 0.0 }
 0xd46   : > { %1705 = vadd.xlane.f32.xlu1 %v1704_v50 }
 0xdb9   : > { %v1706_v49 = vpop.xlane.xlu1 %1705 }
 0xdba   : > { %v1707_v53 = vmul.f32 %v1706_v49, %v2851_v8 }
 0xdbc   : > { %v1708_v54 = vsub.f32 %v3045_v51, %v1707_v53 }
 0xdbe   : > { %v1709_v56 = vmul.f32 %v1708_v54, %v1708_v54  ;;  %v1742_v22 = vmul.f32 %v1741_v20, %v1708_v54 }
 0xdc0   : > { %v1710_v57 = vsel %vm730_vm0, %v1709_v56, 0.0 }
 0xdc1   : > { %1711 = vadd.xlane.f32.xlu2 %v1710_v57 }
 0xe34   : > { %v1712_v61 = vpop.xlane.xlu2 %1711 }
 0xe35   : > { %v1713_v62 = vmul.f32 %v1712_v61, %v2868_v24  ;;  %v1783_v24 = vld [vmem:[%s3184_s26 + $0x28] sm:$0xff] }
 0xe36   : > { %1804 = vmatpush.msrb.mxu0 %v1783_v24 }
 0xe37   : > { %2268 = vrsqrt.f32 %v1713_v62  ;;  %vm1721_vm9 = vcmp.eq.f32.partialorder %v1713_v62, inf  ;;  %v1724_v9 = vand.u32 2147483648, %v1713_v62  ;;  %vm1723_vm13 = vcmp.eq.f32.partialorder %v1713_v62, 0.0 }
 0xe38   : > { %1805 = vmatpush.msrb.mxu0 %v1782_v6 }
 0xe3a   : > { %1806 = vmatpush.msrb.mxu0 %v1781_v10 }
 0xe3c   : > { %1807 = vmatpush.msrb.mxu0 %v1780_v29 }
 0xe3d   : > { %v2269_v1 = vpop.eup %2268 }
 0xe3e   : > { %v1715_v8 = vmul.f32 %v2269_v1, %v1713_v62  ;;  %1808 = vmatpush.msrb.mxu0 %v1779_v30 }
 0xe40   : > { %v1716_v2 = vmul.f32 %v2269_v1, %v1715_v8  ;;  %1809 = vmatpush.msrb.mxu0 %v1778_v31 }
 0xe42   : > { %v1717_v3 = vmul.f32 0.5, %v1716_v2 }
 0xe44   : > { %v1718_v5 = vsub.f32 1.5, %v1717_v3 }
 0xe46   : > { %v1719_v63 = vmul.f32 %v2269_v1, %v1718_v5 }
 0xe48   : > { %v1720_v7 = vmul.f32 %v1719_v63, %v1713_v62 }
 0xe4a   : > { %v1722_v11 = vsel %vm1721_vm9, %v1713_v62, %v1720_v7 }
 0xe4b   : > { %v1725_v12 = vsel %vm1723_vm13, %v1724_v9, %v1722_v11 }
 0xe4c   : > { %v1726_v13 = vadd.f32 1e-06, %v1725_v12 }
 0xe4e   : > { %2270 = vrcp.f32 %v1726_v13  ;;  %v1738_v17 = vand.u32 2147483648, %v1726_v13  ;;  %v1736_v19 = vand.u32 2147483647, %v1726_v13  ;;  %vm1732_vm12 = vweird.f32 %v1726_v13 }
 0xe50   : > { %v1739_v55 = vor.u32 1.1754944e-38, %v1738_v17  ;;  %vm1737_vm1 = vcmp.eq.f32.partialorder %v1736_v19, 8.507059e+37 }
 0xe54   : > { %v2271_v14 = vpop.eup %2270 }
 0xe55   : > { %v1728_v15 = vmul.f32 %v2271_v14, %v1726_v13  ;;  %vm1733_vm14 = vweird.f32 %v2271_v14 }
 0xe56   : > { %vm1734_vm15 = vmor %vm1732_vm12, %vm1733_vm14 }
 0xe57   : > { %v1729_v16 = vsub.f32 1.0, %v1728_v15 }
 0xe59   : > { %v1730_v18 = vmul.f32 %v2271_v14, %v1729_v16 }
 0xe5b   : > { %v1731_v21 = vadd.f32 %v2271_v14, %v1730_v18 }
 0xe5d   : > { %v1735_v23 = vsel %vm1734_vm15, %v2271_v14, %v1731_v21 }
 0xe5e   : > { %v1740_v25 = vsel %vm1737_vm1, %v1739_v55, %v1735_v23 }
 0xe5f   : > { %v1743_v27 = vmul.f32 %v1742_v22, %v1740_v25 }
 0xe61   : > { %v1745_v28 = vadd.f32 %v1744_v26, %v1743_v27 }
 0xe63   : > { %2046 = vmatmul.msk.f32.vlgmr.msrb.gmra.mxu3 %vm730_vm0, %v1745_v28 }
 0xee6   : > { %v1774_v32 = vpop.f32.mrf.mxu3 }
 0xee7   : > { %v1775_v33 = vadd.f32 %v2222_v42, %v1774_v32 }
 0xee9   : > { %v1777_v34 = vmax.f32 %v1775_v33, 0.0 }
 0xeeb   : > { %2047 = vmatmul.msk.f32.vlgmr.msrb.gmra.mxu0 %vm1790_vm2, %v1777_v34 }
 0xf68   : > { %v1811_v36 = vpop.f32.mrf.mxu0 }
 0xf69   : > { %v1812_v37 = vadd.f32 %v2223_v35, %v1811_v36 }
 0xf6b   : > { %v1814_v38 = vadd.f32 %v1812_v37, %v3045_v51 }
 0xf6d   : > { %1815 = vst.msk [vmem:[%s713_s18] sm:$0xff] %vm730_vm0, %v1814_v38 }
 0xf6e   : > { %2509 = shalt.err (!%p2506_p10)
}
 0xf6f   : > { %2083 = dma.vmem_to_hbm [thread:$0]  (%p2786_p13), %s1830_s20, 128, %s1832_s3, %s1817_s21  }
 0xf70 PF: > { %s1843_s8 = sand.u32 1, %s2556_s27   ;;  %p3189_p11 = scmp.ge.s32.totalorder %s2568_s30, 2 }
 0xf71   : > { %s1844_s2 = scalar_lea.sflag [#allocation4], %s1843_s8 }
 0xf72   : > { %p2112_p0 = pnand %p3189_p11, %p2791_p5 }
 0xf74   : > { %p2113_p2 = pneg %p2112_p0 }
 0xf76   : > { %2551 = dma.done.wait (%p2113_p2), %s1844_s2, 128  }
 0xf77   : > { %2553 = vsyncadd (%p2113_p2), %s1844_s2, 4294967168  ;;  %p36_p6 = scmp.ge.s32.totalorder %s2766_s11, 4   ;;  %s3190_s27 = smov %s2560_s28 }
 0xf78   : > { %s3191_s28 = smov %s2564_s29  ;;  %s3192_s29 = smov %s2778_s24 }
 0xf79   : > { %s3193_s30 = smov %s2766_s11  ;;  %38 = sbr.rel (!%p36_p6) target bundleno = 24 (0x18), region = 169 }
 0xf7e   :  { %1850 = vsyncpa [#allocation3], 1 }
 0xf7f   :  { %1852 = vsyncpa [#allocation3 + $0x1], 1 }
 0xf80   :  { %1853 = vsyncpa [#allocation7], 1 }
 0xf81   :  { %1854 = vsyncpa [#allocation10], 1 }
 0xf82   :  { %1855 = vsyncpa [#allocation13], 1 }
 0xf83   :  { %1856 = vsyncpa [#allocation4], 1 }
 0xf84   :  { %1858 = vsyncpa [#allocation4 + $0x1], 1 }
 0xf85   :  { %1859 = vsyncpa [#allocation5], 1 }
 0xf86   :  { %1861 = vsyncpa [#allocation5 + $0x1], 1 }
 0xf87   :  { %1862 = vsyncpa [#allocation16], 1 }

</bundles_post_ra>
